<compile_context>
chip_gen: v5e
topology: v5e:2x2
jax: 0.10.0
libtpu: 0.0.40
codegen_flags: <defaults>
</compile_context>

<pallas_src>
import functools
import math

import jax
import jax.numpy as jnp
from jax.experimental import pallas as pl
from jax.experimental.pallas import tpu as pltpu

F32 = jnp.float32
BF16 = jnp.bfloat16


# ----------------------------------------------------------------------------
# Fused Pallas kernel: conv1 + Inception + flatten + fc1 + fc2
# ----------------------------------------------------------------------------
def _deepspectra_kernel(B, L1,
                        patches_ref, wc_ref, bc_ref,
                        wmix_ref, bmix_ref,
                        w1b_ref, b1b_ref,
                        w2b_ref, b2b_ref,
                        w3_ref, b3_ref,
                        wf1_ref, bf1_ref, wf2_ref, bf2_ref,
                        out_ref):
    """Whole DeepSpectra forward in one VMEM-resident kernel.

    Activations are channels-last with rows ordered r = b*L1 + l.
    """
    f32 = jnp.float32
    R = B * L1
    NEG = float(jnp.finfo(f32).min)   # finite stand-in for -inf maxpool padding

    def mxu(a, w):
        # bf16 MXU inputs, f32 accumulation.
        return jnp.dot(a.astype(BF16), w, preferred_element_type=f32)

    # Per-row position l within its sample (rows are r = b*L1 + l); hoisted.
    l_idx = jax.lax.broadcasted_iota(jnp.int32, (R, 1), 0) % L1

    def shift_rows(a, d, fill):
        # result[r] = a[r + d] when (l + d) stays inside the same sample,
        # else `fill`.  Uses pltpu.roll (jnp.roll convention: result[i] =
        # a[(i - shift) % R]) on the sublane axis -> XLU, no VMEM copy; the
        # mask kills both wrapped rows and cross-batch rows.
        if d == 0:
            return a
        rolled = pltpu.roll(a, (-d) % R, 0)
        valid = jnp.logical_and(l_idx + d >= 0, l_idx + d < L1)
        return jnp.where(valid, rolled, fill)

    def conv_same(a, w_ref, b_ref, k):
        # 'same' 1-D conv along the length axis as k tap-shifted MXU dots.
        pad = (k - 1) // 2
        acc = None
        for j in range(k):                       # k <= 5, unrolled at trace time
            part = mxu(shift_rows(a, j - pad, 0.0), w_ref[j])
            acc = part if acc is None else acc + part
        return acc + b_ref[...]

    # --- conv1: Conv1d(1, 16, k=5, s=3), no activation (im2col patches) ------
    y = mxu(patches_ref[...], wc_ref[...]) + bc_ref[...]          # (R, 16) f32

    # --- fused 1x1 convs on y: [p1 reduce | p2 reduce | shortcut] ------------
    z = mxu(y, wmix_ref[...]) + bmix_ref[...]                     # (R, 160)
    a1 = z[:, 0:32]                                               # p1: 16->32
    a2 = z[:, 32:64]                                              # p2: 16->32
    sc = z[:, 64:160]                                             # shortcut: 16->96 (no bias)

    # --- branch p1: Conv3(32->32, pad=1) --------------------------------------
    p1 = conv_same(a1, w1b_ref, b1b_ref, 3)                       # (R, 32)

    # --- branch p2: Conv5(32->32, pad=2) --------------------------------------
    p2 = conv_same(a2, w2b_ref, b2b_ref, 5)                       # (R, 32)

    # --- branch p3: MaxPool1d(k=3,s=1,pad=1) -> Conv3(16->32, pad=1) ----------
    # (Finite NEG padding is equivalent to -inf: every window contains the
    #  real center element y[r], so the pad value can never win the max.)
    mp = jnp.maximum(jnp.maximum(shift_rows(y, -1, NEG), y),
                     shift_rows(y, 1, NEG))                       # (R, 16)
    p3 = conv_same(mp, w3_ref, b3_ref, 3)                         # (R, 32)

    # --- Inception output: cat([p1,p2,p3], C) + shortcut ----------------------
    feat = jnp.concatenate([p1, p2, p3], axis=-1) + sc            # (R, 96) f32

    # --- flatten + fc1 + Dropout(id) + fc2, all in-register --------------------
    # PyTorch flattens (B, 96, L1) -> features (c*L1 + l); wf1 is stored as
    # (L1, 96, H) so each per-l dot uses exactly that sample-position's weight
    # block, avoiding any sublane->lane reshape of feat.
    feat3 = feat.reshape(B, L1, 96)                               # split leading dim
    h = None
    for l in range(L1):                                           # unrolled, MXU-idle
        part = mxu(feat3[:, l, :], wf1_ref[l])                    # (B, H)
        h = part if h is None else h + part
    h = h + bf1_ref[...]                                          # Linear -> Dropout(0.5)=id
    out_ref[...] = mxu(h, wf2_ref[...]) + bf2_ref[...]            # Linear(H, 1)


# ----------------------------------------------------------------------------
# Forward pass wrapper (only the tiny stem im2col is XLA glue)
# ----------------------------------------------------------------------------
def deepspectra_forward(x_ncl, params):
    B, cin, L = x_ncl.shape
    assert cin == 1
    L1 = (L - 5) // 3 + 1
    x = x_ncl[:, 0, :]                                            # (B, L)

    # im2col for the strided stem conv (k=5, s=3, no padding): tiny (B*L1, 5)
    # glue tensor; the conv itself runs inside the fused kernel.
    patches = jnp.stack(
        [x[:, j:j + 3 * (L1 - 1) + 1:3] for j in range(5)], axis=-1)   # (B, L1, 5)
    patches = patches.reshape(B * L1, 5).astype(F32)

    p = params
    args = (patches,
            p['conv1_w'], p['conv1_b'],
            p['mix_w'], p['mix_b'],
            p['p1b_w'], p['p1b_b'],
            p['p2b_w'], p['p2b_b'],
            p['p3_w'], p['p3_b'],
            p['fc1_w'], p['fc1_b'], p['fc2_w'], p['fc2_b'])

    return pl.pallas_call(
        functools.partial(_deepspectra_kernel, B, L1),
        out_shape=jax.ShapeDtypeStruct((B, 1), F32),
        in_specs=[pl.BlockSpec(memory_space=pltpu.MemorySpace.VMEM)
                  for _ in args],
        out_specs=pl.BlockSpec(memory_space=pltpu.MemorySpace.VMEM),
        compiler_params=pltpu.CompilerParams(
            vmem_limit_bytes=32 * 1024 * 1024),   # fits v7x (64 MiB) with headroom
    )(*args)


# ----------------------------------------------------------------------------
# Deterministic parameter initialization (shapes from DeepSpectra.__init__)
# ----------------------------------------------------------------------------
def init_params(key, L, hidden=128):
    """Weights stored pre-transposed / pre-packed for the fused kernel.

    Conv weights: torch (Cout, Cin, k) -> stored (k, Cin, Cout) so tap j uses
    w_ref[j].  The three 1x1 convs sharing the conv1 output are packed into one
    (16, 160) matrix [p1a | p2a | shortcut] with a fused (1, 160) bias
    (shortcut bias = 0).  fc1 is stored (L1, 96, H), i.e. torch's (c*L1 + l)
    flatten regrouped by sample position l.  Matmul weights are bf16; biases f32.
    """
    L1 = (L - 5) // 3 + 1
    keys = iter(jax.random.split(key, 24))

    def u(k, shape, fan_in):
        b = 1.0 / math.sqrt(fan_in)
        return jax.random.uniform(k, shape, F32, -b, b)

    p = {}

    # conv1: Conv1d(1, 16, 5, stride=3)
    p['conv1_w'] = u(next(keys), (5, 16), 1 * 5).astype(BF16)       # (tap, cout)
    p['conv1_b'] = u(next(keys), (1, 16), 1 * 5)

    # Fused 1x1 convs on conv1 output: p1a(16->32) | p2a(16->32) | shortcut(16->96, no bias)
    w1a = u(next(keys), (16, 32), 16); b1a = u(next(keys), (1, 32), 16)
    w2a = u(next(keys), (16, 32), 16); b2a = u(next(keys), (1, 32), 16)
    wsc = u(next(keys), (16, 96), 16)
    p['mix_w'] = jnp.concatenate([w1a, w2a, wsc], axis=1).astype(BF16)   # (16, 160)
    p['mix_b'] = jnp.concatenate([b1a, b2a, jnp.zeros((1, 96), F32)], axis=1)

    # Spatial convs: stored (tap, cin, cout)
    p['p1b_w'] = u(next(keys), (3, 32, 32), 32 * 3).astype(BF16)
    p['p1b_b'] = u(next(keys), (1, 32), 32 * 3)
    p['p2b_w'] = u(next(keys), (5, 32, 32), 32 * 5).astype(BF16)
    p['p2b_b'] = u(next(keys), (1, 32), 32 * 5)
    p['p3_w'] = u(next(keys), (3, 16, 32), 16 * 3).astype(BF16)
    p['p3_b'] = u(next(keys), (1, 32), 16 * 3)

    # Classifier: Linear(96*L1, hidden) -> Dropout(0.5) -> Linear(hidden, 1)
    # (sized to the demo input; see TODO at the top about the real 20640x5000 fc)
    Fin = 96 * L1
    wt = u(next(keys), (hidden, 96, L1), Fin)                # torch layout (H, C, L1)
    p['fc1_w'] = jnp.transpose(wt, (2, 1, 0)).astype(BF16)   # (L1, 96, H)
    p['fc1_b'] = u(next(keys), (1, hidden), Fin)
    p['fc2_w'] = u(next(keys), (hidden, 1), hidden).astype(BF16)
    p['fc2_b'] = u(next(keys), (1, 1), hidden)
    return p


# ----------------------------------------------------------------------------
if __name__ == "__main__":
    key = jax.random.PRNGKey(0)
    kx, kp = jax.random.split(key)

    # Small demo shapes: B=2, L=50 -> conv1 output length L1 = 16 (a multiple
    # of 8 keeps the (B*L1, C) row layout sublane-aligned).
    B, L, HIDDEN = 2, 50, 128
    x = jax.random.normal(kx, (B, 1, L), F32)          # PyTorch-style NCL input

    params = init_params(kp, L=L, hidden=HIDDEN)

    fwd = jax.jit(lambda xx: deepspectra_forward(xx, params))
    out = jax.block_until_ready(fwd(x))

    assert out.shape == (B, 1), out.shape
    assert bool(jnp.all(jnp.isfinite(out)))
    print("KERNEL_OK")
</pallas_src>

<mosaic_0001>
module attributes {stable_mosaic.version = 11 : i64} {
  func.func @_deepspectra_kernel(%arg0: memref<32x5xf32, #tpu.memory_space<vmem>>, %arg1: memref<5x16xbf16, #tpu.memory_space<vmem>>, %arg2: memref<1x16xf32, #tpu.memory_space<vmem>>, %arg3: memref<16x160xbf16, #tpu.memory_space<vmem>>, %arg4: memref<1x160xf32, #tpu.memory_space<vmem>>, %arg5: memref<3x32x32xbf16, #tpu.memory_space<vmem>>, %arg6: memref<1x32xf32, #tpu.memory_space<vmem>>, %arg7: memref<5x32x32xbf16, #tpu.memory_space<vmem>>, %arg8: memref<1x32xf32, #tpu.memory_space<vmem>>, %arg9: memref<3x16x32xbf16, #tpu.memory_space<vmem>>, %arg10: memref<1x32xf32, #tpu.memory_space<vmem>>, %arg11: memref<16x96x128xbf16, #tpu.memory_space<vmem>>, %arg12: memref<1x128xf32, #tpu.memory_space<vmem>>, %arg13: memref<128x1xbf16, #tpu.memory_space<vmem>>, %arg14: memref<1x1xf32, #tpu.memory_space<vmem>>, %arg15: memref<2x1xf32, #tpu.memory_space<vmem>>) attributes {dimension_semantics = [], scalar_prefetch = 0 : i64, scratch_operands = 0 : i64, tpu.core_type = #tpu.core_type<tc>} {
    %0 = tpu.iota {dimensions = array<i32: 0>} : vector<32x1xi32>
    %c16_i32 = arith.constant 16 : i32
    %c0_i32 = arith.constant 0 : i32
    %1 = arith.cmpi eq, %c16_i32, %c0_i32 : i32
    %c1_i32 = arith.constant 1 : i32
    %2 = arith.select %1, %c1_i32, %c16_i32 : i32
    %3 = vector.broadcast %2 : i32 to vector<32x1xi32>
    %4 = arith.remsi %0, %3 : vector<32x1xi32>
    %c0_i32_0 = arith.constant 0 : i32
    %5 = vector.broadcast %c0_i32_0 : i32 to vector<32x1xi32>
    %6 = arith.cmpi ne, %4, %5 : vector<32x1xi32>
    %c0_i32_1 = arith.constant 0 : i32
    %7 = vector.broadcast %c0_i32_1 : i32 to vector<32x1xi32>
    %8 = arith.cmpi slt, %4, %7 : vector<32x1xi32>
    %c0_i32_2 = arith.constant 0 : i32
    %9 = arith.cmpi slt, %2, %c0_i32_2 : i32
    %10 = vector.broadcast %9 : i1 to vector<32x1xi1>
    %11 = vector.broadcast %10 : vector<32x1xi1> to vector<32x1xi1>
    %12 = arith.xori %8, %11 : vector<32x1xi1>
    %13 = arith.andi %12, %6 : vector<32x1xi1>
    %14 = vector.broadcast %2 : i32 to vector<32x1xi32>
    %15 = arith.addi %4, %14 : vector<32x1xi32>
    %16 = arith.select %13, %15, %4 : vector<32x1xi1>, vector<32x1xi32>
    %c0 = arith.constant 0 : index
    %c0_3 = arith.constant 0 : index
    %17 = vector.load %arg0[%c0, %c0_3] : memref<32x5xf32, #tpu.memory_space<vmem>>, vector<32x5xf32>
    %c0_4 = arith.constant 0 : index
    %c0_5 = arith.constant 0 : index
    %18 = vector.load %arg1[%c0_4, %c0_5] : memref<5x16xbf16, #tpu.memory_space<vmem>>, vector<5x16xbf16>
    %19 = arith.truncf %17 : vector<32x5xf32> to vector<32x5xbf16>
    %cst = arith.constant dense<0.000000e+00> : vector<32x16xf32>
    %20 = tpu.matmul %19, %18, %cst {dimension_numbers = #tpu.dot_dimension_numbers<[1], [0], [0], [1], [0, 0, 1, 1], [], []>} : vector<32x5xbf16>, vector<5x16xbf16>, vector<32x16xf32> -> vector<32x16xf32>
    %c0_6 = arith.constant 0 : index
    %c0_7 = arith.constant 0 : index
    %21 = vector.load %arg2[%c0_6, %c0_7] : memref<1x16xf32, #tpu.memory_space<vmem>>, vector<1x16xf32>
    %22 = vector.broadcast %21 : vector<1x16xf32> to vector<32x16xf32>
    %23 = arith.addf %20, %22 : vector<32x16xf32>
    %c0_8 = arith.constant 0 : index
    %c0_9 = arith.constant 0 : index
    %24 = vector.load %arg3[%c0_8, %c0_9] : memref<16x160xbf16, #tpu.memory_space<vmem>>, vector<16x160xbf16>
    %25 = arith.truncf %23 : vector<32x16xf32> to vector<32x16xbf16>
    %cst_10 = arith.constant dense<0.000000e+00> : vector<32x160xf32>
    %26 = tpu.matmul %25, %24, %cst_10 {dimension_numbers = #tpu.dot_dimension_numbers<[1], [0], [0], [1], [0, 0, 1, 1], [], []>} : vector<32x16xbf16>, vector<16x160xbf16>, vector<32x160xf32> -> vector<32x160xf32>
    %c0_11 = arith.constant 0 : index
    %c0_12 = arith.constant 0 : index
    %27 = vector.load %arg4[%c0_11, %c0_12] : memref<1x160xf32, #tpu.memory_space<vmem>>, vector<1x160xf32>
    %28 = vector.broadcast %27 : vector<1x160xf32> to vector<32x160xf32>
    %29 = arith.addf %26, %28 : vector<32x160xf32>
    %30 = vector.extract_strided_slice %29 {offsets = [0, 0], sizes = [32, 32], strides = [1, 1]} : vector<32x160xf32> to vector<32x32xf32>
    %31 = vector.extract_strided_slice %29 {offsets = [0, 32], sizes = [32, 32], strides = [1, 1]} : vector<32x160xf32> to vector<32x32xf32>
    %32 = vector.extract_strided_slice %29 {offsets = [0, 64], sizes = [32, 96], strides = [1, 1]} : vector<32x160xf32> to vector<32x96xf32>
    %c1_i32_13 = arith.constant 1 : i32
    %33 = tpu.dynamic_rotate %30 by %c1_i32_13 dim 0 : vector<32x32xf32>, i32 -> vector<32x32xf32>
    %c-1_i32 = arith.constant -1 : i32
    %34 = vector.broadcast %c-1_i32 : i32 to vector<32x1xi32>
    %35 = arith.addi %16, %34 : vector<32x1xi32>
    %c0_i32_14 = arith.constant 0 : i32
    %36 = vector.broadcast %c0_i32_14 : i32 to vector<32x1xi32>
    %37 = arith.cmpi sge, %35, %36 : vector<32x1xi32>
    %c-1_i32_15 = arith.constant -1 : i32
    %38 = vector.broadcast %c-1_i32_15 : i32 to vector<32x1xi32>
    %39 = arith.addi %16, %38 : vector<32x1xi32>
    %c16_i32_16 = arith.constant 16 : i32
    %40 = vector.broadcast %c16_i32_16 : i32 to vector<32x1xi32>
    %41 = arith.cmpi slt, %39, %40 : vector<32x1xi32>
    %42 = arith.andi %37, %41 : vector<32x1xi1>
    %cst_17 = arith.constant 0.000000e+00 : f32
    %43 = vector.shape_cast %42 : vector<32x1xi1> to vector<32x1xi1>
    %44 = vector.broadcast %43 : vector<32x1xi1> to vector<32x32xi1>
    %45 = vector.broadcast %cst_17 : f32 to vector<32x32xf32>
    %46 = arith.select %44, %33, %45 : vector<32x32xi1>, vector<32x32xf32>
    %c0_18 = arith.constant 0 : index
    %c0_19 = arith.constant 0 : index
    %c0_20 = arith.constant 0 : index
    %47 = vector.load %arg5[%c0_18, %c0_19, %c0_20] : memref<3x32x32xbf16, #tpu.memory_space<vmem>>, vector<1x32x32xbf16>
    %48 = vector.shape_cast %47 : vector<1x32x32xbf16> to vector<32x32xbf16>
    %49 = arith.truncf %46 : vector<32x32xf32> to vector<32x32xbf16>
    %cst_21 = arith.constant dense<0.000000e+00> : vector<32x32xf32>
    %50 = tpu.matmul %49, %48, %cst_21 {dimension_numbers = #tpu.dot_dimension_numbers<[1], [0], [0], [1], [0, 0, 1, 1], [], []>} : vector<32x32xbf16>, vector<32x32xbf16>, vector<32x32xf32> -> vector<32x32xf32>
    %c1 = arith.constant 1 : index
    %c0_22 = arith.constant 0 : index
    %c0_23 = arith.constant 0 : index
    %51 = vector.load %arg5[%c1, %c0_22, %c0_23] : memref<3x32x32xbf16, #tpu.memory_space<vmem>>, vector<1x32x32xbf16>
    %52 = vector.shape_cast %51 : vector<1x32x32xbf16> to vector<32x32xbf16>
    %53 = arith.truncf %30 : vector<32x32xf32> to vector<32x32xbf16>
    %cst_24 = arith.constant dense<0.000000e+00> : vector<32x32xf32>
    %54 = tpu.matmul %53, %52, %cst_24 {dimension_numbers = #tpu.dot_dimension_numbers<[1], [0], [0], [1], [0, 0, 1, 1], [], []>} : vector<32x32xbf16>, vector<32x32xbf16>, vector<32x32xf32> -> vector<32x32xf32>
    %55 = arith.addf %50, %54 : vector<32x32xf32>
    %c31_i32 = arith.constant 31 : i32
    %56 = tpu.dynamic_rotate %30 by %c31_i32 dim 0 : vector<32x32xf32>, i32 -> vector<32x32xf32>
    %c1_i32_25 = arith.constant 1 : i32
    %57 = vector.broadcast %c1_i32_25 : i32 to vector<32x1xi32>
    %58 = arith.addi %16, %57 : vector<32x1xi32>
    %c0_i32_26 = arith.constant 0 : i32
    %59 = vector.broadcast %c0_i32_26 : i32 to vector<32x1xi32>
    %60 = arith.cmpi sge, %58, %59 : vector<32x1xi32>
    %c1_i32_27 = arith.constant 1 : i32
    %61 = vector.broadcast %c1_i32_27 : i32 to vector<32x1xi32>
    %62 = arith.addi %16, %61 : vector<32x1xi32>
    %c16_i32_28 = arith.constant 16 : i32
    %63 = vector.broadcast %c16_i32_28 : i32 to vector<32x1xi32>
    %64 = arith.cmpi slt, %62, %63 : vector<32x1xi32>
    %65 = arith.andi %60, %64 : vector<32x1xi1>
    %cst_29 = arith.constant 0.000000e+00 : f32
    %66 = vector.shape_cast %65 : vector<32x1xi1> to vector<32x1xi1>
    %67 = vector.broadcast %66 : vector<32x1xi1> to vector<32x32xi1>
    %68 = vector.broadcast %cst_29 : f32 to vector<32x32xf32>
    %69 = arith.select %67, %56, %68 : vector<32x32xi1>, vector<32x32xf32>
    %c2 = arith.constant 2 : index
    %c0_30 = arith.constant 0 : index
    %c0_31 = arith.constant 0 : index
    %70 = vector.load %arg5[%c2, %c0_30, %c0_31] : memref<3x32x32xbf16, #tpu.memory_space<vmem>>, vector<1x32x32xbf16>
    %71 = vector.shape_cast %70 : vector<1x32x32xbf16> to vector<32x32xbf16>
    %72 = arith.truncf %69 : vector<32x32xf32> to vector<32x32xbf16>
    %cst_32 = arith.constant dense<0.000000e+00> : vector<32x32xf32>
    %73 = tpu.matmul %72, %71, %cst_32 {dimension_numbers = #tpu.dot_dimension_numbers<[1], [0], [0], [1], [0, 0, 1, 1], [], []>} : vector<32x32xbf16>, vector<32x32xbf16>, vector<32x32xf32> -> vector<32x32xf32>
    %74 = arith.addf %55, %73 : vector<32x32xf32>
    %c0_33 = arith.constant 0 : index
    %c0_34 = arith.constant 0 : index
    %75 = vector.load %arg6[%c0_33, %c0_34] : memref<1x32xf32, #tpu.memory_space<vmem>>, vector<1x32xf32>
    %76 = vector.broadcast %75 : vector<1x32xf32> to vector<32x32xf32>
    %77 = arith.addf %74, %76 : vector<32x32xf32>
    %c2_i32 = arith.constant 2 : i32
    %78 = tpu.dynamic_rotate %31 by %c2_i32 dim 0 : vector<32x32xf32>, i32 -> vector<32x32xf32>
    %c-2_i32 = arith.constant -2 : i32
    %79 = vector.broadcast %c-2_i32 : i32 to vector<32x1xi32>
    %80 = arith.addi %16, %79 : vector<32x1xi32>
    %c0_i32_35 = arith.constant 0 : i32
    %81 = vector.broadcast %c0_i32_35 : i32 to vector<32x1xi32>
    %82 = arith.cmpi sge, %80, %81 : vector<32x1xi32>
    %c-2_i32_36 = arith.constant -2 : i32
    %83 = vector.broadcast %c-2_i32_36 : i32 to vector<32x1xi32>
    %84 = arith.addi %16, %83 : vector<32x1xi32>
    %c16_i32_37 = arith.constant 16 : i32
    %85 = vector.broadcast %c16_i32_37 : i32 to vector<32x1xi32>
    %86 = arith.cmpi slt, %84, %85 : vector<32x1xi32>
    %87 = arith.andi %82, %86 : vector<32x1xi1>
    %cst_38 = arith.constant 0.000000e+00 : f32
    %88 = vector.shape_cast %87 : vector<32x1xi1> to vector<32x1xi1>
    %89 = vector.broadcast %88 : vector<32x1xi1> to vector<32x32xi1>
    %90 = vector.broadcast %cst_38 : f32 to vector<32x32xf32>
    %91 = arith.select %89, %78, %90 : vector<32x32xi1>, vector<32x32xf32>
    %c0_39 = arith.constant 0 : index
    %c0_40 = arith.constant 0 : index
    %c0_41 = arith.constant 0 : index
    %92 = vector.load %arg7[%c0_39, %c0_40, %c0_41] : memref<5x32x32xbf16, #tpu.memory_space<vmem>>, vector<1x32x32xbf16>
    %93 = vector.shape_cast %92 : vector<1x32x32xbf16> to vector<32x32xbf16>
    %94 = arith.truncf %91 : vector<32x32xf32> to vector<32x32xbf16>
    %cst_42 = arith.constant dense<0.000000e+00> : vector<32x32xf32>
    %95 = tpu.matmul %94, %93, %cst_42 {dimension_numbers = #tpu.dot_dimension_numbers<[1], [0], [0], [1], [0, 0, 1, 1], [], []>} : vector<32x32xbf16>, vector<32x32xbf16>, vector<32x32xf32> -> vector<32x32xf32>
    %c1_i32_43 = arith.constant 1 : i32
    %96 = tpu.dynamic_rotate %31 by %c1_i32_43 dim 0 : vector<32x32xf32>, i32 -> vector<32x32xf32>
    %c-1_i32_44 = arith.constant -1 : i32
    %97 = vector.broadcast %c-1_i32_44 : i32 to vector<32x1xi32>
    %98 = arith.addi %16, %97 : vector<32x1xi32>
    %c0_i32_45 = arith.constant 0 : i32
    %99 = vector.broadcast %c0_i32_45 : i32 to vector<32x1xi32>
    %100 = arith.cmpi sge, %98, %99 : vector<32x1xi32>
    %c-1_i32_46 = arith.constant -1 : i32
    %101 = vector.broadcast %c-1_i32_46 : i32 to vector<32x1xi32>
    %102 = arith.addi %16, %101 : vector<32x1xi32>
    %c16_i32_47 = arith.constant 16 : i32
    %103 = vector.broadcast %c16_i32_47 : i32 to vector<32x1xi32>
    %104 = arith.cmpi slt, %102, %103 : vector<32x1xi32>
    %105 = arith.andi %100, %104 : vector<32x1xi1>
    %cst_48 = arith.constant 0.000000e+00 : f32
    %106 = vector.shape_cast %105 : vector<32x1xi1> to vector<32x1xi1>
    %107 = vector.broadcast %106 : vector<32x1xi1> to vector<32x32xi1>
    %108 = vector.broadcast %cst_48 : f32 to vector<32x32xf32>
    %109 = arith.select %107, %96, %108 : vector<32x32xi1>, vector<32x32xf32>
    %c1_49 = arith.constant 1 : index
    %c0_50 = arith.constant 0 : index
    %c0_51 = arith.constant 0 : index
    %110 = vector.load %arg7[%c1_49, %c0_50, %c0_51] : memref<5x32x32xbf16, #tpu.memory_space<vmem>>, vector<1x32x32xbf16>
    %111 = vector.shape_cast %110 : vector<1x32x32xbf16> to vector<32x32xbf16>
    %112 = arith.truncf %109 : vector<32x32xf32> to vector<32x32xbf16>
    %cst_52 = arith.constant dense<0.000000e+00> : vector<32x32xf32>
    %113 = tpu.matmul %112, %111, %cst_52 {dimension_numbers = #tpu.dot_dimension_numbers<[1], [0], [0], [1], [0, 0, 1, 1], [], []>} : vector<32x32xbf16>, vector<32x32xbf16>, vector<32x32xf32> -> vector<32x32xf32>
    %114 = arith.addf %95, %113 : vector<32x32xf32>
    %c2_53 = arith.constant 2 : index
    %c0_54 = arith.constant 0 : index
    %c0_55 = arith.constant 0 : index
    %115 = vector.load %arg7[%c2_53, %c0_54, %c0_55] : memref<5x32x32xbf16, #tpu.memory_space<vmem>>, vector<1x32x32xbf16>
    %116 = vector.shape_cast %115 : vector<1x32x32xbf16> to vector<32x32xbf16>
    %117 = arith.truncf %31 : vector<32x32xf32> to vector<32x32xbf16>
    %cst_56 = arith.constant dense<0.000000e+00> : vector<32x32xf32>
    %118 = tpu.matmul %117, %116, %cst_56 {dimension_numbers = #tpu.dot_dimension_numbers<[1], [0], [0], [1], [0, 0, 1, 1], [], []>} : vector<32x32xbf16>, vector<32x32xbf16>, vector<32x32xf32> -> vector<32x32xf32>
    %119 = arith.addf %114, %118 : vector<32x32xf32>
    %c31_i32_57 = arith.constant 31 : i32
    %120 = tpu.dynamic_rotate %31 by %c31_i32_57 dim 0 : vector<32x32xf32>, i32 -> vector<32x32xf32>
    %c1_i32_58 = arith.constant 1 : i32
    %121 = vector.broadcast %c1_i32_58 : i32 to vector<32x1xi32>
    %122 = arith.addi %16, %121 : vector<32x1xi32>
    %c0_i32_59 = arith.constant 0 : i32
    %123 = vector.broadcast %c0_i32_59 : i32 to vector<32x1xi32>
    %124 = arith.cmpi sge, %122, %123 : vector<32x1xi32>
    %c1_i32_60 = arith.constant 1 : i32
    %125 = vector.broadcast %c1_i32_60 : i32 to vector<32x1xi32>
    %126 = arith.addi %16, %125 : vector<32x1xi32>
    %c16_i32_61 = arith.constant 16 : i32
    %127 = vector.broadcast %c16_i32_61 : i32 to vector<32x1xi32>
    %128 = arith.cmpi slt, %126, %127 : vector<32x1xi32>
    %129 = arith.andi %124, %128 : vector<32x1xi1>
    %cst_62 = arith.constant 0.000000e+00 : f32
    %130 = vector.shape_cast %129 : vector<32x1xi1> to vector<32x1xi1>
    %131 = vector.broadcast %130 : vector<32x1xi1> to vector<32x32xi1>
    %132 = vector.broadcast %cst_62 : f32 to vector<32x32xf32>
    %133 = arith.select %131, %120, %132 : vector<32x32xi1>, vector<32x32xf32>
    %c3 = arith.constant 3 : index
    %c0_63 = arith.constant 0 : index
    %c0_64 = arith.constant 0 : index
    %134 = vector.load %arg7[%c3, %c0_63, %c0_64] : memref<5x32x32xbf16, #tpu.memory_space<vmem>>, vector<1x32x32xbf16>
    %135 = vector.shape_cast %134 : vector<1x32x32xbf16> to vector<32x32xbf16>
    %136 = arith.truncf %133 : vector<32x32xf32> to vector<32x32xbf16>
    %cst_65 = arith.constant dense<0.000000e+00> : vector<32x32xf32>
    %137 = tpu.matmul %136, %135, %cst_65 {dimension_numbers = #tpu.dot_dimension_numbers<[1], [0], [0], [1], [0, 0, 1, 1], [], []>} : vector<32x32xbf16>, vector<32x32xbf16>, vector<32x32xf32> -> vector<32x32xf32>
    %138 = arith.addf %119, %137 : vector<32x32xf32>
    %c30_i32 = arith.constant 30 : i32
    %139 = tpu.dynamic_rotate %31 by %c30_i32 dim 0 : vector<32x32xf32>, i32 -> vector<32x32xf32>
    %c2_i32_66 = arith.constant 2 : i32
    %140 = vector.broadcast %c2_i32_66 : i32 to vector<32x1xi32>
    %141 = arith.addi %16, %140 : vector<32x1xi32>
    %c0_i32_67 = arith.constant 0 : i32
    %142 = vector.broadcast %c0_i32_67 : i32 to vector<32x1xi32>
    %143 = arith.cmpi sge, %141, %142 : vector<32x1xi32>
    %c2_i32_68 = arith.constant 2 : i32
    %144 = vector.broadcast %c2_i32_68 : i32 to vector<32x1xi32>
    %145 = arith.addi %16, %144 : vector<32x1xi32>
    %c16_i32_69 = arith.constant 16 : i32
    %146 = vector.broadcast %c16_i32_69 : i32 to vector<32x1xi32>
    %147 = arith.cmpi slt, %145, %146 : vector<32x1xi32>
    %148 = arith.andi %143, %147 : vector<32x1xi1>
    %cst_70 = arith.constant 0.000000e+00 : f32
    %149 = vector.shape_cast %148 : vector<32x1xi1> to vector<32x1xi1>
    %150 = vector.broadcast %149 : vector<32x1xi1> to vector<32x32xi1>
    %151 = vector.broadcast %cst_70 : f32 to vector<32x32xf32>
    %152 = arith.select %150, %139, %151 : vector<32x32xi1>, vector<32x32xf32>
    %c4 = arith.constant 4 : index
    %c0_71 = arith.constant 0 : index
    %c0_72 = arith.constant 0 : index
    %153 = vector.load %arg7[%c4, %c0_71, %c0_72] : memref<5x32x32xbf16, #tpu.memory_space<vmem>>, vector<1x32x32xbf16>
    %154 = vector.shape_cast %153 : vector<1x32x32xbf16> to vector<32x32xbf16>
    %155 = arith.truncf %152 : vector<32x32xf32> to vector<32x32xbf16>
    %cst_73 = arith.constant dense<0.000000e+00> : vector<32x32xf32>
    %156 = tpu.matmul %155, %154, %cst_73 {dimension_numbers = #tpu.dot_dimension_numbers<[1], [0], [0], [1], [0, 0, 1, 1], [], []>} : vector<32x32xbf16>, vector<32x32xbf16>, vector<32x32xf32> -> vector<32x32xf32>
    %157 = arith.addf %138, %156 : vector<32x32xf32>
    %c0_74 = arith.constant 0 : index
    %c0_75 = arith.constant 0 : index
    %158 = vector.load %arg8[%c0_74, %c0_75] : memref<1x32xf32, #tpu.memory_space<vmem>>, vector<1x32xf32>
    %159 = vector.broadcast %158 : vector<1x32xf32> to vector<32x32xf32>
    %160 = arith.addf %157, %159 : vector<32x32xf32>
    %c1_i32_76 = arith.constant 1 : i32
    %161 = tpu.dynamic_rotate %23 by %c1_i32_76 dim 0 : vector<32x16xf32>, i32 -> vector<32x16xf32>
    %c-1_i32_77 = arith.constant -1 : i32
    %162 = vector.broadcast %c-1_i32_77 : i32 to vector<32x1xi32>
    %163 = arith.addi %16, %162 : vector<32x1xi32>
    %c0_i32_78 = arith.constant 0 : i32
    %164 = vector.broadcast %c0_i32_78 : i32 to vector<32x1xi32>
    %165 = arith.cmpi sge, %163, %164 : vector<32x1xi32>
    %c-1_i32_79 = arith.constant -1 : i32
    %166 = vector.broadcast %c-1_i32_79 : i32 to vector<32x1xi32>
    %167 = arith.addi %16, %166 : vector<32x1xi32>
    %c16_i32_80 = arith.constant 16 : i32
    %168 = vector.broadcast %c16_i32_80 : i32 to vector<32x1xi32>
    %169 = arith.cmpi slt, %167, %168 : vector<32x1xi32>
    %170 = arith.andi %165, %169 : vector<32x1xi1>
    %cst_81 = arith.constant -3.40282347E+38 : f32
    %171 = vector.shape_cast %170 : vector<32x1xi1> to vector<32x1xi1>
    %172 = vector.broadcast %171 : vector<32x1xi1> to vector<32x16xi1>
    %173 = vector.broadcast %cst_81 : f32 to vector<32x16xf32>
    %174 = arith.select %172, %161, %173 : vector<32x16xi1>, vector<32x16xf32>
    %175 = arith.maximumf %174, %23 : vector<32x16xf32>
    %c31_i32_82 = arith.constant 31 : i32
    %176 = tpu.dynamic_rotate %23 by %c31_i32_82 dim 0 : vector<32x16xf32>, i32 -> vector<32x16xf32>
    %c1_i32_83 = arith.constant 1 : i32
    %177 = vector.broadcast %c1_i32_83 : i32 to vector<32x1xi32>
    %178 = arith.addi %16, %177 : vector<32x1xi32>
    %c0_i32_84 = arith.constant 0 : i32
    %179 = vector.broadcast %c0_i32_84 : i32 to vector<32x1xi32>
    %180 = arith.cmpi sge, %178, %179 : vector<32x1xi32>
    %c1_i32_85 = arith.constant 1 : i32
    %181 = vector.broadcast %c1_i32_85 : i32 to vector<32x1xi32>
    %182 = arith.addi %16, %181 : vector<32x1xi32>
    %c16_i32_86 = arith.constant 16 : i32
    %183 = vector.broadcast %c16_i32_86 : i32 to vector<32x1xi32>
    %184 = arith.cmpi slt, %182, %183 : vector<32x1xi32>
    %185 = arith.andi %180, %184 : vector<32x1xi1>
    %cst_87 = arith.constant -3.40282347E+38 : f32
    %186 = vector.shape_cast %185 : vector<32x1xi1> to vector<32x1xi1>
    %187 = vector.broadcast %186 : vector<32x1xi1> to vector<32x16xi1>
    %188 = vector.broadcast %cst_87 : f32 to vector<32x16xf32>
    %189 = arith.select %187, %176, %188 : vector<32x16xi1>, vector<32x16xf32>
    %190 = arith.maximumf %175, %189 : vector<32x16xf32>
    %c1_i32_88 = arith.constant 1 : i32
    %191 = tpu.dynamic_rotate %190 by %c1_i32_88 dim 0 : vector<32x16xf32>, i32 -> vector<32x16xf32>
    %c-1_i32_89 = arith.constant -1 : i32
    %192 = vector.broadcast %c-1_i32_89 : i32 to vector<32x1xi32>
    %193 = arith.addi %16, %192 : vector<32x1xi32>
    %c0_i32_90 = arith.constant 0 : i32
    %194 = vector.broadcast %c0_i32_90 : i32 to vector<32x1xi32>
    %195 = arith.cmpi sge, %193, %194 : vector<32x1xi32>
    %c-1_i32_91 = arith.constant -1 : i32
    %196 = vector.broadcast %c-1_i32_91 : i32 to vector<32x1xi32>
    %197 = arith.addi %16, %196 : vector<32x1xi32>
    %c16_i32_92 = arith.constant 16 : i32
    %198 = vector.broadcast %c16_i32_92 : i32 to vector<32x1xi32>
    %199 = arith.cmpi slt, %197, %198 : vector<32x1xi32>
    %200 = arith.andi %195, %199 : vector<32x1xi1>
    %cst_93 = arith.constant 0.000000e+00 : f32
    %201 = vector.shape_cast %200 : vector<32x1xi1> to vector<32x1xi1>
    %202 = vector.broadcast %201 : vector<32x1xi1> to vector<32x16xi1>
    %203 = vector.broadcast %cst_93 : f32 to vector<32x16xf32>
    %204 = arith.select %202, %191, %203 : vector<32x16xi1>, vector<32x16xf32>
    %c0_94 = arith.constant 0 : index
    %c0_95 = arith.constant 0 : index
    %c0_96 = arith.constant 0 : index
    %205 = vector.load %arg9[%c0_94, %c0_95, %c0_96] : memref<3x16x32xbf16, #tpu.memory_space<vmem>>, vector<1x16x32xbf16>
    %206 = vector.shape_cast %205 : vector<1x16x32xbf16> to vector<16x32xbf16>
    %207 = arith.truncf %204 : vector<32x16xf32> to vector<32x16xbf16>
    %cst_97 = arith.constant dense<0.000000e+00> : vector<32x32xf32>
    %208 = tpu.matmul %207, %206, %cst_97 {dimension_numbers = #tpu.dot_dimension_numbers<[1], [0], [0], [1], [0, 0, 1, 1], [], []>} : vector<32x16xbf16>, vector<16x32xbf16>, vector<32x32xf32> -> vector<32x32xf32>
    %c1_98 = arith.constant 1 : index
    %c0_99 = arith.constant 0 : index
    %c0_100 = arith.constant 0 : index
    %209 = vector.load %arg9[%c1_98, %c0_99, %c0_100] : memref<3x16x32xbf16, #tpu.memory_space<vmem>>, vector<1x16x32xbf16>
    %210 = vector.shape_cast %209 : vector<1x16x32xbf16> to vector<16x32xbf16>
    %211 = arith.truncf %190 : vector<32x16xf32> to vector<32x16xbf16>
    %cst_101 = arith.constant dense<0.000000e+00> : vector<32x32xf32>
    %212 = tpu.matmul %211, %210, %cst_101 {dimension_numbers = #tpu.dot_dimension_numbers<[1], [0], [0], [1], [0, 0, 1, 1], [], []>} : vector<32x16xbf16>, vector<16x32xbf16>, vector<32x32xf32> -> vector<32x32xf32>
    %213 = arith.addf %208, %212 : vector<32x32xf32>
    %c31_i32_102 = arith.constant 31 : i32
    %214 = tpu.dynamic_rotate %190 by %c31_i32_102 dim 0 : vector<32x16xf32>, i32 -> vector<32x16xf32>
    %c1_i32_103 = arith.constant 1 : i32
    %215 = vector.broadcast %c1_i32_103 : i32 to vector<32x1xi32>
    %216 = arith.addi %16, %215 : vector<32x1xi32>
    %c0_i32_104 = arith.constant 0 : i32
    %217 = vector.broadcast %c0_i32_104 : i32 to vector<32x1xi32>
    %218 = arith.cmpi sge, %216, %217 : vector<32x1xi32>
    %c1_i32_105 = arith.constant 1 : i32
    %219 = vector.broadcast %c1_i32_105 : i32 to vector<32x1xi32>
    %220 = arith.addi %16, %219 : vector<32x1xi32>
    %c16_i32_106 = arith.constant 16 : i32
    %221 = vector.broadcast %c16_i32_106 : i32 to vector<32x1xi32>
    %222 = arith.cmpi slt, %220, %221 : vector<32x1xi32>
    %223 = arith.andi %218, %222 : vector<32x1xi1>
    %cst_107 = arith.constant 0.000000e+00 : f32
    %224 = vector.shape_cast %223 : vector<32x1xi1> to vector<32x1xi1>
    %225 = vector.broadcast %224 : vector<32x1xi1> to vector<32x16xi1>
    %226 = vector.broadcast %cst_107 : f32 to vector<32x16xf32>
    %227 = arith.select %225, %214, %226 : vector<32x16xi1>, vector<32x16xf32>
    %c2_108 = arith.constant 2 : index
    %c0_109 = arith.constant 0 : index
    %c0_110 = arith.constant 0 : index
    %228 = vector.load %arg9[%c2_108, %c0_109, %c0_110] : memref<3x16x32xbf16, #tpu.memory_space<vmem>>, vector<1x16x32xbf16>
    %229 = vector.shape_cast %228 : vector<1x16x32xbf16> to vector<16x32xbf16>
    %230 = arith.truncf %227 : vector<32x16xf32> to vector<32x16xbf16>
    %cst_111 = arith.constant dense<0.000000e+00> : vector<32x32xf32>
    %231 = tpu.matmul %230, %229, %cst_111 {dimension_numbers = #tpu.dot_dimension_numbers<[1], [0], [0], [1], [0, 0, 1, 1], [], []>} : vector<32x16xbf16>, vector<16x32xbf16>, vector<32x32xf32> -> vector<32x32xf32>
    %232 = arith.addf %213, %231 : vector<32x32xf32>
    %c0_112 = arith.constant 0 : index
    %c0_113 = arith.constant 0 : index
    %233 = vector.load %arg10[%c0_112, %c0_113] : memref<1x32xf32, #tpu.memory_space<vmem>>, vector<1x32xf32>
    %234 = vector.broadcast %233 : vector<1x32xf32> to vector<32x32xf32>
    %235 = arith.addf %232, %234 : vector<32x32xf32>
    %236 = tpu.concatenate %77, %160, %235 in 1 : vector<32x32xf32>, vector<32x32xf32>, vector<32x32xf32> -> vector<32x96xf32>
    %237 = arith.addf %236, %32 : vector<32x96xf32>
    %238 = vector.shape_cast %237 : vector<32x96xf32> to vector<2x16x96xf32>
    %239 = vector.extract_strided_slice %238 {offsets = [0, 0, 0], sizes = [2, 1, 96], strides = [1, 1, 1]} : vector<2x16x96xf32> to vector<2x1x96xf32>
    %240 = vector.shape_cast %239 : vector<2x1x96xf32> to vector<2x96xf32>
    %c0_114 = arith.constant 0 : index
    %c0_115 = arith.constant 0 : index
    %c0_116 = arith.constant 0 : index
    %241 = vector.load %arg11[%c0_114, %c0_115, %c0_116] : memref<16x96x128xbf16, #tpu.memory_space<vmem>>, vector<1x96x128xbf16>
    %242 = vector.shape_cast %241 : vector<1x96x128xbf16> to vector<96x128xbf16>
    %243 = arith.truncf %240 : vector<2x96xf32> to vector<2x96xbf16>
    %cst_117 = arith.constant dense<0.000000e+00> : vector<2x128xf32>
    %244 = tpu.matmul %243, %242, %cst_117 {dimension_numbers = #tpu.dot_dimension_numbers<[1], [0], [0], [1], [0, 0, 1, 1], [], []>} : vector<2x96xbf16>, vector<96x128xbf16>, vector<2x128xf32> -> vector<2x128xf32>
    %245 = vector.extract_strided_slice %238 {offsets = [0, 1, 0], sizes = [2, 1, 96], strides = [1, 1, 1]} : vector<2x16x96xf32> to vector<2x1x96xf32>
    %246 = vector.shape_cast %245 : vector<2x1x96xf32> to vector<2x96xf32>
    %c1_118 = arith.constant 1 : index
    %c0_119 = arith.constant 0 : index
    %c0_120 = arith.constant 0 : index
    %247 = vector.load %arg11[%c1_118, %c0_119, %c0_120] : memref<16x96x128xbf16, #tpu.memory_space<vmem>>, vector<1x96x128xbf16>
    %248 = vector.shape_cast %247 : vector<1x96x128xbf16> to vector<96x128xbf16>
    %249 = arith.truncf %246 : vector<2x96xf32> to vector<2x96xbf16>
    %cst_121 = arith.constant dense<0.000000e+00> : vector<2x128xf32>
    %250 = tpu.matmul %249, %248, %cst_121 {dimension_numbers = #tpu.dot_dimension_numbers<[1], [0], [0], [1], [0, 0, 1, 1], [], []>} : vector<2x96xbf16>, vector<96x128xbf16>, vector<2x128xf32> -> vector<2x128xf32>
    %251 = arith.addf %244, %250 : vector<2x128xf32>
    %252 = vector.extract_strided_slice %238 {offsets = [0, 2, 0], sizes = [2, 1, 96], strides = [1, 1, 1]} : vector<2x16x96xf32> to vector<2x1x96xf32>
    %253 = vector.shape_cast %252 : vector<2x1x96xf32> to vector<2x96xf32>
    %c2_122 = arith.constant 2 : index
    %c0_123 = arith.constant 0 : index
    %c0_124 = arith.constant 0 : index
    %254 = vector.load %arg11[%c2_122, %c0_123, %c0_124] : memref<16x96x128xbf16, #tpu.memory_space<vmem>>, vector<1x96x128xbf16>
    %255 = vector.shape_cast %254 : vector<1x96x128xbf16> to vector<96x128xbf16>
    %256 = arith.truncf %253 : vector<2x96xf32> to vector<2x96xbf16>
    %cst_125 = arith.constant dense<0.000000e+00> : vector<2x128xf32>
    %257 = tpu.matmul %256, %255, %cst_125 {dimension_numbers = #tpu.dot_dimension_numbers<[1], [0], [0], [1], [0, 0, 1, 1], [], []>} : vector<2x96xbf16>, vector<96x128xbf16>, vector<2x128xf32> -> vector<2x128xf32>
    %258 = arith.addf %251, %257 : vector<2x128xf32>
    %259 = vector.extract_strided_slice %238 {offsets = [0, 3, 0], sizes = [2, 1, 96], strides = [1, 1, 1]} : vector<2x16x96xf32> to vector<2x1x96xf32>
    %260 = vector.shape_cast %259 : vector<2x1x96xf32> to vector<2x96xf32>
    %c3_126 = arith.constant 3 : index
    %c0_127 = arith.constant 0 : index
    %c0_128 = arith.constant 0 : index
    %261 = vector.load %arg11[%c3_126, %c0_127, %c0_128] : memref<16x96x128xbf16, #tpu.memory_space<vmem>>, vector<1x96x128xbf16>
    %262 = vector.shape_cast %261 : vector<1x96x128xbf16> to vector<96x128xbf16>
    %263 = arith.truncf %260 : vector<2x96xf32> to vector<2x96xbf16>
    %cst_129 = arith.constant dense<0.000000e+00> : vector<2x128xf32>
    %264 = tpu.matmul %263, %262, %cst_129 {dimension_numbers = #tpu.dot_dimension_numbers<[1], [0], [0], [1], [0, 0, 1, 1], [], []>} : vector<2x96xbf16>, vector<96x128xbf16>, vector<2x128xf32> -> vector<2x128xf32>
    %265 = arith.addf %258, %264 : vector<2x128xf32>
    %266 = vector.extract_strided_slice %238 {offsets = [0, 4, 0], sizes = [2, 1, 96], strides = [1, 1, 1]} : vector<2x16x96xf32> to vector<2x1x96xf32>
    %267 = vector.shape_cast %266 : vector<2x1x96xf32> to vector<2x96xf32>
    %c4_130 = arith.constant 4 : index
    %c0_131 = arith.constant 0 : index
    %c0_132 = arith.constant 0 : index
    %268 = vector.load %arg11[%c4_130, %c0_131, %c0_132] : memref<16x96x128xbf16, #tpu.memory_space<vmem>>, vector<1x96x128xbf16>
    %269 = vector.shape_cast %268 : vector<1x96x128xbf16> to vector<96x128xbf16>
    %270 = arith.truncf %267 : vector<2x96xf32> to vector<2x96xbf16>
    %cst_133 = arith.constant dense<0.000000e+00> : vector<2x128xf32>
    %271 = tpu.matmul %270, %269, %cst_133 {dimension_numbers = #tpu.dot_dimension_numbers<[1], [0], [0], [1], [0, 0, 1, 1], [], []>} : vector<2x96xbf16>, vector<96x128xbf16>, vector<2x128xf32> -> vector<2x128xf32>
    %272 = arith.addf %265, %271 : vector<2x128xf32>
    %273 = vector.extract_strided_slice %238 {offsets = [0, 5, 0], sizes = [2, 1, 96], strides = [1, 1, 1]} : vector<2x16x96xf32> to vector<2x1x96xf32>
    %274 = vector.shape_cast %273 : vector<2x1x96xf32> to vector<2x96xf32>
    %c5 = arith.constant 5 : index
    %c0_134 = arith.constant 0 : index
    %c0_135 = arith.constant 0 : index
    %275 = vector.load %arg11[%c5, %c0_134, %c0_135] : memref<16x96x128xbf16, #tpu.memory_space<vmem>>, vector<1x96x128xbf16>
    %276 = vector.shape_cast %275 : vector<1x96x128xbf16> to vector<96x128xbf16>
    %277 = arith.truncf %274 : vector<2x96xf32> to vector<2x96xbf16>
    %cst_136 = arith.constant dense<0.000000e+00> : vector<2x128xf32>
    %278 = tpu.matmul %277, %276, %cst_136 {dimension_numbers = #tpu.dot_dimension_numbers<[1], [0], [0], [1], [0, 0, 1, 1], [], []>} : vector<2x96xbf16>, vector<96x128xbf16>, vector<2x128xf32> -> vector<2x128xf32>
    %279 = arith.addf %272, %278 : vector<2x128xf32>
    %280 = vector.extract_strided_slice %238 {offsets = [0, 6, 0], sizes = [2, 1, 96], strides = [1, 1, 1]} : vector<2x16x96xf32> to vector<2x1x96xf32>
    %281 = vector.shape_cast %280 : vector<2x1x96xf32> to vector<2x96xf32>
    %c6 = arith.constant 6 : index
    %c0_137 = arith.constant 0 : index
    %c0_138 = arith.constant 0 : index
    %282 = vector.load %arg11[%c6, %c0_137, %c0_138] : memref<16x96x128xbf16, #tpu.memory_space<vmem>>, vector<1x96x128xbf16>
    %283 = vector.shape_cast %282 : vector<1x96x128xbf16> to vector<96x128xbf16>
    %284 = arith.truncf %281 : vector<2x96xf32> to vector<2x96xbf16>
    %cst_139 = arith.constant dense<0.000000e+00> : vector<2x128xf32>
    %285 = tpu.matmul %284, %283, %cst_139 {dimension_numbers = #tpu.dot_dimension_numbers<[1], [0], [0], [1], [0, 0, 1, 1], [], []>} : vector<2x96xbf16>, vector<96x128xbf16>, vector<2x128xf32> -> vector<2x128xf32>
    %286 = arith.addf %279, %285 : vector<2x128xf32>
    %287 = vector.extract_strided_slice %238 {offsets = [0, 7, 0], sizes = [2, 1, 96], strides = [1, 1, 1]} : vector<2x16x96xf32> to vector<2x1x96xf32>
    %288 = vector.shape_cast %287 : vector<2x1x96xf32> to vector<2x96xf32>
    %c7 = arith.constant 7 : index
    %c0_140 = arith.constant 0 : index
    %c0_141 = arith.constant 0 : index
    %289 = vector.load %arg11[%c7, %c0_140, %c0_141] : memref<16x96x128xbf16, #tpu.memory_space<vmem>>, vector<1x96x128xbf16>
    %290 = vector.shape_cast %289 : vector<1x96x128xbf16> to vector<96x128xbf16>
    %291 = arith.truncf %288 : vector<2x96xf32> to vector<2x96xbf16>
    %cst_142 = arith.constant dense<0.000000e+00> : vector<2x128xf32>
    %292 = tpu.matmul %291, %290, %cst_142 {dimension_numbers = #tpu.dot_dimension_numbers<[1], [0], [0], [1], [0, 0, 1, 1], [], []>} : vector<2x96xbf16>, vector<96x128xbf16>, vector<2x128xf32> -> vector<2x128xf32>
    %293 = arith.addf %286, %292 : vector<2x128xf32>
    %294 = vector.extract_strided_slice %238 {offsets = [0, 8, 0], sizes = [2, 1, 96], strides = [1, 1, 1]} : vector<2x16x96xf32> to vector<2x1x96xf32>
    %295 = vector.shape_cast %294 : vector<2x1x96xf32> to vector<2x96xf32>
    %c8 = arith.constant 8 : index
    %c0_143 = arith.constant 0 : index
    %c0_144 = arith.constant 0 : index
    %296 = vector.load %arg11[%c8, %c0_143, %c0_144] : memref<16x96x128xbf16, #tpu.memory_space<vmem>>, vector<1x96x128xbf16>
    %297 = vector.shape_cast %296 : vector<1x96x128xbf16> to vector<96x128xbf16>
    %298 = arith.truncf %295 : vector<2x96xf32> to vector<2x96xbf16>
    %cst_145 = arith.constant dense<0.000000e+00> : vector<2x128xf32>
    %299 = tpu.matmul %298, %297, %cst_145 {dimension_numbers = #tpu.dot_dimension_numbers<[1], [0], [0], [1], [0, 0, 1, 1], [], []>} : vector<2x96xbf16>, vector<96x128xbf16>, vector<2x128xf32> -> vector<2x128xf32>
    %300 = arith.addf %293, %299 : vector<2x128xf32>
    %301 = vector.extract_strided_slice %238 {offsets = [0, 9, 0], sizes = [2, 1, 96], strides = [1, 1, 1]} : vector<2x16x96xf32> to vector<2x1x96xf32>
    %302 = vector.shape_cast %301 : vector<2x1x96xf32> to vector<2x96xf32>
    %c9 = arith.constant 9 : index
    %c0_146 = arith.constant 0 : index
    %c0_147 = arith.constant 0 : index
    %303 = vector.load %arg11[%c9, %c0_146, %c0_147] : memref<16x96x128xbf16, #tpu.memory_space<vmem>>, vector<1x96x128xbf16>
    %304 = vector.shape_cast %303 : vector<1x96x128xbf16> to vector<96x128xbf16>
    %305 = arith.truncf %302 : vector<2x96xf32> to vector<2x96xbf16>
    %cst_148 = arith.constant dense<0.000000e+00> : vector<2x128xf32>
    %306 = tpu.matmul %305, %304, %cst_148 {dimension_numbers = #tpu.dot_dimension_numbers<[1], [0], [0], [1], [0, 0, 1, 1], [], []>} : vector<2x96xbf16>, vector<96x128xbf16>, vector<2x128xf32> -> vector<2x128xf32>
    %307 = arith.addf %300, %306 : vector<2x128xf32>
    %308 = vector.extract_strided_slice %238 {offsets = [0, 10, 0], sizes = [2, 1, 96], strides = [1, 1, 1]} : vector<2x16x96xf32> to vector<2x1x96xf32>
    %309 = vector.shape_cast %308 : vector<2x1x96xf32> to vector<2x96xf32>
    %c10 = arith.constant 10 : index
    %c0_149 = arith.constant 0 : index
    %c0_150 = arith.constant 0 : index
    %310 = vector.load %arg11[%c10, %c0_149, %c0_150] : memref<16x96x128xbf16, #tpu.memory_space<vmem>>, vector<1x96x128xbf16>
    %311 = vector.shape_cast %310 : vector<1x96x128xbf16> to vector<96x128xbf16>
    %312 = arith.truncf %309 : vector<2x96xf32> to vector<2x96xbf16>
    %cst_151 = arith.constant dense<0.000000e+00> : vector<2x128xf32>
    %313 = tpu.matmul %312, %311, %cst_151 {dimension_numbers = #tpu.dot_dimension_numbers<[1], [0], [0], [1], [0, 0, 1, 1], [], []>} : vector<2x96xbf16>, vector<96x128xbf16>, vector<2x128xf32> -> vector<2x128xf32>
    %314 = arith.addf %307, %313 : vector<2x128xf32>
    %315 = vector.extract_strided_slice %238 {offsets = [0, 11, 0], sizes = [2, 1, 96], strides = [1, 1, 1]} : vector<2x16x96xf32> to vector<2x1x96xf32>
    %316 = vector.shape_cast %315 : vector<2x1x96xf32> to vector<2x96xf32>
    %c11 = arith.constant 11 : index
    %c0_152 = arith.constant 0 : index
    %c0_153 = arith.constant 0 : index
    %317 = vector.load %arg11[%c11, %c0_152, %c0_153] : memref<16x96x128xbf16, #tpu.memory_space<vmem>>, vector<1x96x128xbf16>
    %318 = vector.shape_cast %317 : vector<1x96x128xbf16> to vector<96x128xbf16>
    %319 = arith.truncf %316 : vector<2x96xf32> to vector<2x96xbf16>
    %cst_154 = arith.constant dense<0.000000e+00> : vector<2x128xf32>
    %320 = tpu.matmul %319, %318, %cst_154 {dimension_numbers = #tpu.dot_dimension_numbers<[1], [0], [0], [1], [0, 0, 1, 1], [], []>} : vector<2x96xbf16>, vector<96x128xbf16>, vector<2x128xf32> -> vector<2x128xf32>
    %321 = arith.addf %314, %320 : vector<2x128xf32>
    %322 = vector.extract_strided_slice %238 {offsets = [0, 12, 0], sizes = [2, 1, 96], strides = [1, 1, 1]} : vector<2x16x96xf32> to vector<2x1x96xf32>
    %323 = vector.shape_cast %322 : vector<2x1x96xf32> to vector<2x96xf32>
    %c12 = arith.constant 12 : index
    %c0_155 = arith.constant 0 : index
    %c0_156 = arith.constant 0 : index
    %324 = vector.load %arg11[%c12, %c0_155, %c0_156] : memref<16x96x128xbf16, #tpu.memory_space<vmem>>, vector<1x96x128xbf16>
    %325 = vector.shape_cast %324 : vector<1x96x128xbf16> to vector<96x128xbf16>
    %326 = arith.truncf %323 : vector<2x96xf32> to vector<2x96xbf16>
    %cst_157 = arith.constant dense<0.000000e+00> : vector<2x128xf32>
    %327 = tpu.matmul %326, %325, %cst_157 {dimension_numbers = #tpu.dot_dimension_numbers<[1], [0], [0], [1], [0, 0, 1, 1], [], []>} : vector<2x96xbf16>, vector<96x128xbf16>, vector<2x128xf32> -> vector<2x128xf32>
    %328 = arith.addf %321, %327 : vector<2x128xf32>
    %329 = vector.extract_strided_slice %238 {offsets = [0, 13, 0], sizes = [2, 1, 96], strides = [1, 1, 1]} : vector<2x16x96xf32> to vector<2x1x96xf32>
    %330 = vector.shape_cast %329 : vector<2x1x96xf32> to vector<2x96xf32>
    %c13 = arith.constant 13 : index
    %c0_158 = arith.constant 0 : index
    %c0_159 = arith.constant 0 : index
    %331 = vector.load %arg11[%c13, %c0_158, %c0_159] : memref<16x96x128xbf16, #tpu.memory_space<vmem>>, vector<1x96x128xbf16>
    %332 = vector.shape_cast %331 : vector<1x96x128xbf16> to vector<96x128xbf16>
    %333 = arith.truncf %330 : vector<2x96xf32> to vector<2x96xbf16>
    %cst_160 = arith.constant dense<0.000000e+00> : vector<2x128xf32>
    %334 = tpu.matmul %333, %332, %cst_160 {dimension_numbers = #tpu.dot_dimension_numbers<[1], [0], [0], [1], [0, 0, 1, 1], [], []>} : vector<2x96xbf16>, vector<96x128xbf16>, vector<2x128xf32> -> vector<2x128xf32>
    %335 = arith.addf %328, %334 : vector<2x128xf32>
    %336 = vector.extract_strided_slice %238 {offsets = [0, 14, 0], sizes = [2, 1, 96], strides = [1, 1, 1]} : vector<2x16x96xf32> to vector<2x1x96xf32>
    %337 = vector.shape_cast %336 : vector<2x1x96xf32> to vector<2x96xf32>
    %c14 = arith.constant 14 : index
    %c0_161 = arith.constant 0 : index
    %c0_162 = arith.constant 0 : index
    %338 = vector.load %arg11[%c14, %c0_161, %c0_162] : memref<16x96x128xbf16, #tpu.memory_space<vmem>>, vector<1x96x128xbf16>
    %339 = vector.shape_cast %338 : vector<1x96x128xbf16> to vector<96x128xbf16>
    %340 = arith.truncf %337 : vector<2x96xf32> to vector<2x96xbf16>
    %cst_163 = arith.constant dense<0.000000e+00> : vector<2x128xf32>
    %341 = tpu.matmul %340, %339, %cst_163 {dimension_numbers = #tpu.dot_dimension_numbers<[1], [0], [0], [1], [0, 0, 1, 1], [], []>} : vector<2x96xbf16>, vector<96x128xbf16>, vector<2x128xf32> -> vector<2x128xf32>
    %342 = arith.addf %335, %341 : vector<2x128xf32>
    %343 = vector.extract_strided_slice %238 {offsets = [0, 15, 0], sizes = [2, 1, 96], strides = [1, 1, 1]} : vector<2x16x96xf32> to vector<2x1x96xf32>
    %344 = vector.shape_cast %343 : vector<2x1x96xf32> to vector<2x96xf32>
    %c15 = arith.constant 15 : index
    %c0_164 = arith.constant 0 : index
    %c0_165 = arith.constant 0 : index
    %345 = vector.load %arg11[%c15, %c0_164, %c0_165] : memref<16x96x128xbf16, #tpu.memory_space<vmem>>, vector<1x96x128xbf16>
    %346 = vector.shape_cast %345 : vector<1x96x128xbf16> to vector<96x128xbf16>
    %347 = arith.truncf %344 : vector<2x96xf32> to vector<2x96xbf16>
    %cst_166 = arith.constant dense<0.000000e+00> : vector<2x128xf32>
    %348 = tpu.matmul %347, %346, %cst_166 {dimension_numbers = #tpu.dot_dimension_numbers<[1], [0], [0], [1], [0, 0, 1, 1], [], []>} : vector<2x96xbf16>, vector<96x128xbf16>, vector<2x128xf32> -> vector<2x128xf32>
    %349 = arith.addf %342, %348 : vector<2x128xf32>
    %c0_167 = arith.constant 0 : index
    %c0_168 = arith.constant 0 : index
    %350 = vector.load %arg12[%c0_167, %c0_168] : memref<1x128xf32, #tpu.memory_space<vmem>>, vector<1x128xf32>
    %351 = vector.broadcast %350 : vector<1x128xf32> to vector<2x128xf32>
    %352 = arith.addf %349, %351 : vector<2x128xf32>
    %c0_169 = arith.constant 0 : index
    %c0_170 = arith.constant 0 : index
    %353 = vector.load %arg13[%c0_169, %c0_170] : memref<128x1xbf16, #tpu.memory_space<vmem>>, vector<128x1xbf16>
    %354 = arith.truncf %352 : vector<2x128xf32> to vector<2x128xbf16>
    %cst_171 = arith.constant dense<0.000000e+00> : vector<2x1xf32>
    %355 = tpu.matmul %354, %353, %cst_171 {dimension_numbers = #tpu.dot_dimension_numbers<[1], [0], [0], [1], [0, 0, 1, 1], [], []>} : vector<2x128xbf16>, vector<128x1xbf16>, vector<2x1xf32> -> vector<2x1xf32>
    %c0_172 = arith.constant 0 : index
    %c0_173 = arith.constant 0 : index
    %356 = vector.load %arg14[%c0_172, %c0_173] : memref<1x1xf32, #tpu.memory_space<vmem>>, vector<1x1xf32>
    %357 = vector.broadcast %356 : vector<1x1xf32> to vector<2x1xf32>
    %358 = arith.addf %355, %357 : vector<2x1xf32>
    %c0_174 = arith.constant 0 : index
    %c0_175 = arith.constant 0 : index
    %359 = vector.load %arg15[%c0_174, %c0_175] : memref<2x1xf32, #tpu.memory_space<vmem>>, vector<2x1xf32>
    tpu.vector_store %arg15[%c0_174, %c0_175], %358 {strides = array<i32>} : memref<2x1xf32, #tpu.memory_space<vmem>>, vector<2x1xf32>,
    return
  }
}

</mosaic_0001>

<bundles_post_ra>
// kernel: _lambda_.1
= control target key start
LH: loop header
LB: loop body
LE: loop exit
PB: predicated region body
PF: predicated region fallthrough
CT: control target
= control target key end

     0   :  { %s3838_s0 = inlined_call_operand.vmem [shape: f32[32,5], index: 0, kind: input, shape index: {}]   ;;  %s3839_s1 = inlined_call_operand.vmem [shape: bf16[5,16], index: 1, kind: input, shape index: {}]   ;;  %s3840_s2 = inlined_call_operand.hbm [shape: f32[1,16], index: 2, kind: input, shape index: {}]   ;;  %s3841_s3 = inlined_call_operand.hbm [shape: bf16[16,160], index: 3, kind: input, shape index: {}]   ;;  %s3842_s4 = inlined_call_operand.vmem [shape: f32[1,160], index: 4, kind: input, shape index: {}]   ;;  %s3843_s5 = inlined_call_operand.hbm [shape: bf16[3,32,32], index: 5, kind: input, shape index: {}]   ;;  %s3844_s6 = inlined_call_operand.vmem [shape: f32[1,32], index: 6, kind: input, shape index: {}]   ;;  %s3845_s7 = inlined_call_operand.vmem [shape: bf16[5,32,32], index: 7, kind: input, shape index: {}]   ;;  %s3846_s8 = inlined_call_operand.vmem [shape: f32[1,32], index: 8, kind: input, shape index: {}]   ;;  %s3847_s9 = inlined_call_operand.hbm [shape: bf16[3,16,32], index: 9, kind: input, shape index: {}]   ;;  %s3848_s10 = inlined_call_operand.vmem [shape: f32[1,32], index: 10, kind: input, shape index: {}]   ;;  %s3849_s11 = inlined_call_operand.hbm [shape: bf16[16,96,128], index: 11, kind: input, shape index: {}]   ;;  %s3850_s12 = inlined_call_operand.vmem [shape: f32[1,128], index: 12, kind: input, shape index: {}]   ;;  %s3851_s13 = inlined_call_operand.hbm [shape: bf16[128,1], index: 13, kind: input, shape index: {}]   ;;  %s3852_s14 = inlined_call_operand.<no memory space> [shape: f32[1,1], index: 14, kind: input, shape index: {}]   ;;  %s3853_s15 = inlined_call_operand.vmem [shape: f32[2,1], index: 15, kind: output, shape index: {}]  }
   0x1   :  { %v20_v0 = vstv %s3852_s14 }
   0x2   :  { %21 = vst [vmem:[#allocation2] sm:$0x1] %v20_v0 }
   0x3   :  { %22 = vsyncpa [#allocation4], 0 }
   0x4   :  { %23 = vsyncpa [#allocation6], 0 }
   0x5   :  { %24 = vsyncpa [#allocation9], 0  ;;  %s45_s22 = sshll.u32 %s3841_s3, 4  ;;  %s46_s22 = int_to_ptr.hbm [resolvable:$true] %s45_s22 }
   0x6   :  { %25 = vsyncpa [#allocation12], 0  ;;  %s3216_s23 = smov [#allocation5]   ;;  %s3217_s25 = smov 128  }
   0x7   :  { %s47_s24 = sshll.u32 %s3216_s23, 4  ;;  %s3218_s26 = smov 8   ;;  %s48_s24 = int_to_ptr.vmem [resolvable:$true] %s47_s24 }
   0x8   :  { %53 = dma.hbm_to_vmem [thread:$0]  %s46_s22, 256, %s48_s24, [#allocation6], %s3217_s25, %s3217_s25, %s3218_s26  }
   0x9   :  { %s79_s14 = sshll.u32 %s3847_s9, 4  ;;  %s3219_s29 = smov [#allocation8]   ;;  %s80_s14 = int_to_ptr.hbm [resolvable:$true] %s79_s14 }
   0xa   :  { %s81_s30 = sshll.u32 %s3219_s29, 4  ;;  %s35_s18 = sshll.u32 %s3840_s2, 4  ;;  %s82_s30 = int_to_ptr.vmem [resolvable:$true] %s81_s30  ;;  %s36_s18 = int_to_ptr.hbm [resolvable:$true] %s35_s18 }
   0xb   :  { %s3220_s3 = smov 64   ;;  %s3221_s19 = smov 4  }
   0xc   :  { %87 = dma.hbm_to_vmem [thread:$0]  %s80_s14, 384, %s82_s30, [#allocation9], %s3220_s3, %s3220_s3, %s3221_s19  }
   0xd   :  { %s60_s22 = sshll.u32 %s3843_s5, 4  ;;  %s3222_s23 = smov [#allocation3]   ;;  %s61_s22 = int_to_ptr.hbm [resolvable:$true] %s60_s22 }
   0xe   :  { %s37_s9 = sshll.u32 %s3222_s23, 4  ;;  %s3223_s24 = smov [#allocation7]   ;;  %s38_s9 = int_to_ptr.vmem [resolvable:$true] %s37_s9 }
   0xf   :  { %40 = dma.hbm_to_vmem [thread:$0]  %s36_s18, 16, %s38_s9, [#allocation4]  }
  0x10   :  { %s62_s25 = sshll.u32 %s3223_s24, 4  ;;  %s94_s27 = sshll.u32 %s3849_s11, 4  ;;  %s63_s25 = int_to_ptr.vmem [resolvable:$true] %s62_s25  ;;  %s95_s27 = int_to_ptr.hbm [resolvable:$true] %s94_s27 }
  0x11   :  { %68 = dma.hbm_to_vmem [thread:$0]  %s61_s22, 768, %s63_s25, [#allocation6], %s3220_s3, %s3220_s3, %s3221_s19  }
  0x12   :  { %s109_s5 = sshll.u32 %s3851_s13, 4  ;;  %s3224_s29 = smov [#allocation10]   ;;  %s110_s5 = int_to_ptr.hbm [resolvable:$true] %s109_s5 }
  0x13   :  { %s96_s30 = sshll.u32 %s3224_s29, 4  ;;  %s3225_s16 = smov [#allocation11]   ;;  %s97_s30 = int_to_ptr.vmem [resolvable:$true] %s96_s30 }
  0x14   :  { %102 = dma.hbm_to_vmem [thread:$0]  %s95_s27, 12288, %s97_s30, [#allocation9], %s3220_s3, %s3220_s3, %s3221_s19  }
  0x15   :  { %s111_s17 = sshll.u32 %s3225_s16, 4  ;;  %s112_s17 = int_to_ptr.vmem [resolvable:$true] %s111_s17 }
  0x16   :  { %117 = dma.hbm_to_vmem [thread:$0]  %s110_s5, 1024, %s112_s17, [#allocation12], %s3220_s3, %s3220_s3, %s3221_s19  }
  0x17   :  { %3208 = dma.done.wait [#allocation4], 16  }
  0x18   :  { %3209 = vsyncadd [#allocation4], 4294967280 }
  0x19   :  { %3210 = dma.done.wait [#allocation6], 1024  }
  0x1a   :  { %3211 = vsyncadd [#allocation6], 4294966272 }
  0x1b   :  { %3212 = dma.done.wait [#allocation9], 12672  }
  0x1c   :  { %3213 = vsyncadd [#allocation9], 4294954624 }
  0x1d   :  { %3214 = dma.done.wait [#allocation12], 1024  }
  0x1e   :  { %3215 = vsyncadd [#allocation12], 4294966272  ;;  %vm216_vm0 = vcmask 1041408   ;;  %vm217_vm1 = vcmask 1042432   ;;  %v3226_v1 = vmov 65535   ;;  %v198_v5 = vld [vmem:[%s3838_s0] sm:$0xff]  ;;  %v145_v18 = vlaneseq }
  0x1f   :  { %v218_v2 = vsel %vm216_vm0, 4294967295, %v3226_v1  ;;  %v202_v4 = vld [vmem:[%s3839_s1] sm:$0x7]  ;;  %v199_v6 = vld [vmem:[%s3838_s0 + $0x8] sm:$0xff]  ;;  %v200_v8 = vld [vmem:[%s3838_s0 + $0x10] sm:$0xff]  ;;  %vm209_vm2 = vcmask 39936  }
  0x20   :  { %v219_v3 = vsel %vm217_vm1, %v218_v2, 0  ;;  %v201_v9 = vld [vmem:[%s3838_s0 + $0x18] sm:$0xff]  ;;  %v2358_v10 = vld [vmem:[#allocation5] sm:$0xf]  ;;  %v203_v11 = vpack.c.bf16 %v199_v6, %v198_v5  ;;  %v2915_v13 = vld [vmem:[#allocation5 + $0x4] sm:$0xf0] }
  0x21   :  { %v221_v7 = vand.u32 %v219_v3, %v202_v4  ;;  %v204_v12 = vpack.c.bf16 %v201_v9, %v200_v8  ;;  %v2359_v14 = vor.u32 %v2915_v13, %v2358_v10  ;;  %v2914_v15 = vld [vmem:[#allocation5 + $0x4] sm:$0xf]  ;;  %v2360_v16 = vld [vmem:[#allocation5 + $0x8] sm:$0xf0]  ;;  %v3353_v19 = vshrl.u32 %v145_v18, 7 }
  0x22   :  { %v2363_v17 = vor.u32 %v2914_v15, %v2360_v16  ;;  %v3058_v25 = vld [vmem:[#allocation3] ss:$0 sm:$0xff]  ;;  %vm262_vm6 = vcmask 130048   ;;  %vm369_vm10 = vcmask 261120   ;;  %vm1093_vm1 = vcmask 523264  }
  0x23   :  { %230 = vmatpush.bf16.msra.mxu0 %v221_v7  ;;  %3039 = vmatpush.bf16.msra.mxu1 %v221_v7  ;;  %v3356_v20 = vadd.s32 8, %v3353_v19  ;;  %v3359_v23 = vadd.s32 24, %v3353_v19  ;;  %v3362_v24 = vadd.s32 16, %v3353_v19  ;;  %v154_v27 = vand.u32 15, %v3353_v19 }
  0x24   :  { %295 = vmatpush.bf16.msra.mxu2 %v2363_v17  ;;  %vm311_vm3 = vcmp.lt.s32.totalorder %v3353_v19, 1  ;;  %vm436_vm4 = vcmp.lt.s32.totalorder %v3353_v19, 7  ;;  %vm545_vm11 = vcmp.lt.s32.totalorder %v3353_v19, 2  ;;  %vm793_vm14 = vcmp.lt.s32.totalorder %v3353_v19, 6 }
  0x25   :  { %v161_v26 = vand.u32 15, %v3356_v20  ;;  %v175_v28 = vand.u32 15, %v3359_v23  ;;  %v168_v29 = vand.u32 15, %v3362_v24  ;;  %v3378_v35 = vadd.s32 4294967295, %v154_v27 }
  0x26   :  { %2354 = vmatmul.msk.bf16.vlgmr.msra.gmra.mxu0 %vm209_vm2, %v203_v11  ;;  %2355 = vmatmul.msk.bf16.vlgmr.msra.gmra.mxu1 %vm209_vm2, %v204_v12  ;;  %vm1162_vm2 = vcmask 1041409  }
  0x27   :  { %276 = vmatpush.bf16.msrb.mxu1 %v2359_v14  ;;  %v3372_v32 = vadd.s32 1, %v161_v26  ;;  %v3382_v36 = vadd.s32 1, %v175_v28  ;;  %v3386_v37 = vadd.s32 4294967295, %v168_v29  ;;  %vm320_vm7 = vcmp.ge.s32.totalorder %v3378_v35, 0 }
  0x28   :  { %v801_v20 = vadd.s32 2, %v175_v28 }
  0x29   :  { %vm450_vm5 = vcmp.lt.s32.totalorder %v3372_v32, 16  ;;  %vm452_vm8 = vcmp.lt.s32.totalorder %v3382_v36, 16  ;;  %vm322_vm9 = vcmp.ge.s32.totalorder %v3386_v37, 0 }
  0x2a   :  { %vm809_vm0 = vcmp.lt.s32.totalorder %v801_v20, 16 }
  0xa3   :  { %v232_v21 = vpop.f32.mrf.mxu0  ;;  %v237_v22 = vpop.f32.mrf.mxu1 }
  0xa4   :  { %v3368_v30 = vadd.f32 %v3058_v25, %v237_v22  ;;  %v233_v31 = vadd.f32 %v3058_v25, %v232_v21 }
  0xa6   :  { %v884_v38 = vrot.slane %v3368_v30, 7  ;;  %v900_v39 = vrot.slane %v3368_v30, 1  ;;  %v882_v42 = vrot.slane %v233_v31, 7  ;;  %v898_v43 = vrot.slane %v233_v31, 1 }
  0xab   :  { %v234_v33 = vpop.f32.mrf.mxu0  ;;  %v239_v34 = vpop.f32.mrf.mxu1 }
  0xac   :  { %v235_v40 = vadd.f32 %v3058_v25, %v234_v33  ;;  %v240_v41 = vadd.f32 %v3058_v25, %v239_v34 }
  0xae   :  { %v883_v44 = vrot.slane %v235_v40, 7  ;;  %v899_v45 = vrot.slane %v235_v40, 1  ;;  %v885_v46 = vrot.slane %v240_v41, 7  ;;  %v901_v47 = vrot.slane %v240_v41, 1 }
  0xaf   :  { %v244_v48 = vpack.c.bf16 %v235_v40, %v233_v31 }
  0xb0   :  { %v887_v49 = vsel %vm311_vm3, %v883_v44, %v884_v38  ;;  %v888_v50 = vsel %vm311_vm3, %v882_v42, %v883_v44  ;;  %v903_v51 = vsel %vm436_vm4, %v899_v45, %v900_v39  ;;  %v904_v52 = vsel %vm436_vm4, %v898_v43, %v899_v45 }
  0xb1   :  { %v895_v53 = vmax.f32 %v888_v50, %v235_v40  ;;  %v907_v54 = vsel %vm450_vm5, %v903_v51, -3.4028235e+38  ;;  %v886_v55 = vsel %vm311_vm3, %v884_v38, %v885_v46  ;;  %v889_v56 = vsel %vm311_vm3, %v885_v46, %v882_v42  ;;  %2364 = vmatmul.msk.bf16.vlgmr.msrb.gmra.mxu1 %vm262_vm6, %v244_v48  ;;  %2366 = vmatmul.msk.bf16.vlgmr.msra.gmra.mxu2 %vm262_vm6, %v244_v48  ;;  %v2919_v46 = vld [vmem:[#allocation7 + $0x18] sm:$0xff]  ;;  %v2921_v48 = vld [vmem:[#allocation7 + $0x28] sm:$0xff]  ;;  %v2916_v51 = vld [vmem:[#allocation7] sm:$0xff] }
  0xb2   :  { %v897_v57 = vmax.f32 %v886_v55, %v240_v41  ;;  %v902_v58 = vsel %vm436_vm4, %v900_v39, %v901_v47  ;;  %v905_v59 = vsel %vm436_vm4, %v901_v47, %v898_v43  ;;  %v890_v60 = vsel %vm320_vm7, %v889_v56, -3.4028235e+38  ;;  %382 = vmatpush.bf16.msra.mxu3 %v2919_v46  ;;  %v2918_v47 = vld [vmem:[#allocation7 + $0x10] sm:$0xff]  ;;  %500 = vmatpush.bf16.msra.mxu1 %v2921_v48  ;;  %v2917_v50 = vld [vmem:[#allocation7 + $0x8] sm:$0xff] }
  0xb3   :  { %v3416_v61 = vmax.f32 %v895_v53, %v907_v54  ;;  %v894_v62 = vmax.f32 %v890_v60, %v233_v31  ;;  %v909_v63 = vsel %vm452_vm8, %v905_v59, -3.4028235e+38  ;;  %v892_v0 = vsel %vm322_vm9, %v887_v49, -3.4028235e+38  ;;  %v2920_v49 = vld [vmem:[#allocation7 + $0x20] sm:$0xff]  ;;  %419 = vmatpush.bf16.msrb.mxu0 %v2917_v50 }
  0xb4   :  { %v3422_v1 = vmax.f32 %v897_v57, %v909_v63  ;;  %v896_v2 = vmax.f32 %v892_v0, %v3368_v30  ;;  %v245_v45 = vpack.c.bf16 %v240_v41, %v3368_v30  ;;  %v246_v30 = vld [vmem:[%s3842_s4] sm:$0x3]  ;;  %s3227_s4 = smov 96  }
  0xb5   :  { %v915_v3 = vrot.slane %v3416_v61, 7  ;;  %v998_v4 = vrot.slane %v3416_v61, 1  ;;  %v3427_v5 = vmax.f32 %v894_v62, %v904_v52  ;;  %v248_v41 = vperm.slane %v246_v30, 0 }
  0xb6   :  { %v917_v6 = vrot.slane %v3422_v1, 7  ;;  %v3430_v7 = vmax.f32 %v896_v2, %v902_v58  ;;  %v1000_v8 = vrot.slane %v3422_v1, 1  ;;  %383 = vmatpush.bf16.msra.mxu3 %v2918_v47  ;;  %501 = vmatpush.bf16.msra.mxu1 %v2920_v49  ;;  %v3498_v58 = vperm.slane %v246_v30, 1 }
  0xb7   :  { %v914_v9 = vrot.slane %v3427_v5, 7  ;;  %v933_v10 = vpack.c.bf16 %v3416_v61, %v3427_v5  ;;  %v997_v11 = vrot.slane %v3427_v5, 1  ;;  %420 = vmatpush.bf16.msrb.mxu0 %v2916_v51 }
  0xb8   :  { %v916_v12 = vrot.slane %v3430_v7, 7  ;;  %v999_v13 = vrot.slane %v3430_v7, 1  ;;  %v934_v14 = vpack.c.bf16 %v3422_v1, %v3430_v7 }
  0xb9   :  { %v3443_v15 = vsel %vm311_vm3, %v914_v9, %v915_v3  ;;  %v921_v16 = vsel %vm311_vm3, %v917_v6, %v914_v9  ;;  %v3449_v17 = vsel %vm436_vm4, %v997_v11, %v998_v4  ;;  %v1004_v18 = vsel %vm436_vm4, %v1000_v8, %v997_v11 }
  0xba   :  { %v3455_v21 = vsel %vm320_vm7, %v921_v16, 0.0  ;;  %v3459_v22 = vsel %vm311_vm3, %v916_v12, %v917_v6  ;;  %v919_v25 = vsel %vm311_vm3, %v915_v3, %v916_v12  ;;  %v1002_v31 = vsel %vm436_vm4, %v998_v4, %v999_v13 }
  0xbb   :  { %v928_v33 = vpack.c.bf16 %v3443_v15, %v3455_v21  ;;  %v3469_v34 = vsel %vm322_vm9, %v919_v25, 0.0  ;;  %v3473_v38 = vsel %vm450_vm5, %v1002_v31, 0.0  ;;  %v3477_v39 = vsel %vm436_vm4, %v999_v13, %v1000_v8 }
  0xbc   :  { %v929_v40 = vpack.c.bf16 %v3459_v22, %v3469_v34  ;;  %v1012_v42 = vpack.c.bf16 %v3473_v38, %v3449_v17  ;;  %v3485_v43 = vsel %vm452_vm8, %v1004_v18, 0.0 }
  0xbd   :  { %v1013_v44 = vpack.c.bf16 %v3485_v43, %v3477_v39 }
  0xc1   :  { %2365 = vmatmul.msk.bf16.gmra.mxu1 %vm262_vm6, %v245_v45  ;;  %2367 = vmatmul.msk.bf16.gmra.mxu2 %vm262_vm6, %v245_v45 }
 0x12e   :  { %v278_v52 = vpop.f32.mrf.mxu1 }
 0x12f   :  { %v279_v55 = vadd.f32 %v278_v52, %v248_v41 }
 0x131   :  { %v432_v3 = vrot.slane %v279_v55, 1  ;;  %v307_v46 = vrot.slane %v279_v55, 7 }
 0x134   :  { %v297_v53 = vpop.f32.mrf.mxu2 }
 0x135   :  { %v298_v30 = vadd.f32 %v297_v53, %v3498_v58 }
 0x136   :  { %v280_v54 = vpop.f32.mrf.mxu1 }
 0x137   :  { %v3495_v56 = vadd.f32 %v280_v54, %v248_v41 }
 0x139   :  { %v355_v57 = vpack.c.bf16 %v3495_v56, %v279_v55  ;;  %v433_v0 = vrot.slane %v3495_v56, 1  ;;  %v308_v18 = vrot.slane %v3495_v56, 7 }
 0x13b   :  { %2376 = vmatmul.msk.bf16.vlgmr.msra.gmra.mxu3 %vm369_vm10, %v355_v57  ;;  %v439_v8 = vsel %vm436_vm4, %v432_v3, %v433_v0  ;;  %v314_v49 = vsel %vm311_vm3, %v307_v46, %v308_v18 }
 0x13c   :  { %v299_v59 = vpop.f32.mrf.mxu2 }
 0x13d   :  { %v3502_v60 = vadd.f32 %v299_v59, %v3498_v58 }
 0x13e   :  { %v283_v62 = vpop.f32.mrf.mxu1 }
 0x13f   :  { %v3504_v63 = vadd.f32 %v283_v62, %v248_v41 }
 0x141   :  { %v434_v2 = vrot.slane %v3504_v63, 1  ;;  %533 = vrot.lane.b32.xlu1 %v3504_v63, %s3227_s4  ;;  %v309_v59 = vrot.slane %v3504_v63, 7 }
 0x143   :  { %v438_v4 = vsel %vm436_vm4, %v433_v0, %v434_v2  ;;  %v313_v53 = vsel %vm311_vm3, %v308_v18, %v309_v59  ;;  %v2931_v18 = vld [vmem:[%s3845_s7 + $0x48] sm:$0xff] }
 0x144   :  { %v302_v6 = vpop.f32.mrf.mxu2  ;;  %v466_v9 = vsel %vm450_vm5, %v438_v4, 0.0  ;;  %v342_v62 = vsel %vm322_vm9, %v313_v53, 0.0  ;;  %v2927_v4 = vld [vmem:[%s3845_s7 + $0x28] sm:$0xff] }
 0x145   :  { %v3517_v11 = vadd.f32 %v302_v6, %v3498_v58  ;;  %v474_v12 = vpack.c.bf16 %v466_v9, %v439_v8  ;;  %v2929_v6 = vld [vmem:[%s3845_s7 + $0x38] sm:$0xff]  ;;  %712 = vmatpush.bf16.msra.mxu0 %v2927_v4  ;;  %v2926_v8 = vld [vmem:[%s3845_s7 + $0x20] sm:$0xff]  ;;  %v2924_v9 = vld [vmem:[%s3845_s7 + $0x10] sm:$0xff] }
 0x146   :  { %v285_v13 = vpop.f32.mrf.mxu1  ;;  %772 = vmatpush.bf16.msrb.mxu1 %v2929_v6 }
 0x147   :  { %v3519_v16 = vadd.f32 %v285_v13, %v248_v41  ;;  %2396 = vmatmul.msk.bf16.vlgmr.msra.gmra.mxu1 %vm369_vm10, %v474_v12  ;;  %v2922_v12 = vld [vmem:[%s3845_s7] sm:$0xff]  ;;  %v2928_v13 = vld [vmem:[%s3845_s7 + $0x30] sm:$0xff] }
 0x149   :  { %v310_v25 = vrot.slane %v3519_v16, 7  ;;  %684 = vrot.lane.b32.xlu1 %v355_v57, %s3227_s4  ;;  %v356_v31 = vpack.c.bf16 %v3519_v16, %v3504_v63  ;;  %v3053_v45 = vpack.i.bf16 %v3519_v16, %v279_v55  ;;  %v435_v48 = vrot.slane %v3519_v16, 1  ;;  %713 = vmatpush.bf16.msra.mxu0 %v2926_v8 }
 0x14a   :  { %773 = vmatpush.bf16.msrb.mxu1 %v2928_v13 }
 0x14b   :  { %686 = vrot.lane.b32.xlu2 %v356_v31, %s3227_s4  ;;  %3054 = vrot.lane.b32.xlu0 %v3053_v45, %s3227_s4  ;;  %v315_v47 = vsel %vm311_vm3, %v310_v25, %v307_v46  ;;  %v440_v52 = vsel %vm436_vm4, %v435_v48, %v432_v3  ;;  %v437_v41 = vsel %vm436_vm4, %v434_v2, %v435_v48  ;;  %v2925_v2 = vld [vmem:[%s3845_s7 + $0x18] sm:$0xff]  ;;  %v2923_v3 = vld [vmem:[%s3845_s7 + $0x8] sm:$0xff] }
 0x14c   :  { %2377 = vmatmul.msk.bf16.gmra.mxu3 %vm369_vm10, %v356_v31  ;;  %v340_v50 = vsel %vm320_vm7, %v315_v47, 0.0  ;;  %v468_v54 = vsel %vm452_vm8, %v440_v52, 0.0  ;;  %627 = vmatpush.bf16.msrb.mxu2 %v2925_v2  ;;  %v2932_v45 = vld [vmem:[#allocation8] sm:$0xff]  ;;  %v2934_v46 = vld [vmem:[#allocation8 + $0x10] sm:$0xff]  ;;  %v3699_v22 = vpop.f32.mrf.mxu2 }
 0x14d   :  { %v348_v51 = vpack.c.bf16 %v314_v49, %v340_v50  ;;  %v475_v57 = vpack.c.bf16 %v468_v54, %v437_v41  ;;  %664 = vmatpush.bf16.msrb.mxu3 %v2923_v3  ;;  %v2930_v41 = vld [vmem:[%s3845_s7 + $0x40] sm:$0xff] }
 0x14e   :  { %1033 = vmatpush.bf16.msra.mxu1 %v2934_v46 }
 0x14f   :  { %2386 = vmatmul.msk.bf16.vlgmr.msrb.gmra.mxu0 %vm369_vm10, %v348_v51 }
 0x150   :  { %628 = vmatpush.bf16.msrb.mxu2 %v2924_v9  ;;  %985 = vmatpush.bf16.msrb.mxu0 %v2932_v45 }
 0x151   :  { %1102 = vrot.lane.b32.xlu1 %v279_v55, %s3220_s3  ;;  %v312_v55 = vsel %vm311_vm3, %v309_v59, %v310_v25  ;;  %665 = vmatpush.bf16.msrb.mxu3 %v2922_v12  ;;  %v2933_v25 = vld [vmem:[#allocation8 + $0x8] sm:$0xff] }
 0x152   :  { %v349_v0 = vpack.c.bf16 %v312_v55, %v342_v62 }
 0x153   :  { %1104 = vrot.lane.b32.xlu2 %v298_v30, %s3220_s3  ;;  %531 = vrot.lane.b32.xlu0 %v3495_v56, %s3227_s4  ;;  %v550_v30 = vadd.s32 4294967294, %v154_v27  ;;  %s3228_s4 = smov 32  }
 0x154   :  { %857 = vmatpush.bf16.msra.mxu2 %v2931_v18 }
 0x155   :  { %954 = vmatpush.bf16.msra.mxu3 %v2933_v25  ;;  %vm554_vm12 = vcmp.ge.s32.totalorder %v550_v30, 0 }
 0x157   :  { %2397 = vmatmul.msk.bf16.gmra.mxu1 %vm369_vm10, %v475_v57 }
 0x158   :  { %858 = vmatpush.bf16.msra.mxu2 %v2930_v41 }
 0x15f   :  { %2387 = vmatmul.msk.bf16.gmra.mxu0 %vm369_vm10, %v349_v0 }
 0x1a5   :  { %v687_v30 = vpop.permute.xlu2 %686 }
 0x1b3   :  { %v3586_v31 = vpop.permute.xlu1 %533 }
 0x1b4   :  { %v731_v59 = vrot.slane %v3586_v31, 1 }
 0x1bb   :  { %v685_v47 = vpop.permute.xlu1 %684 }
 0x1bc   :  { %2434 = vmatmul.msk.bf16.vlgmr.msra.gmra.mxu0 %vm369_vm10, %v685_v47 }
 0x1bd   :  { %v3055_v48 = vpop.permute.xlu0 %3054 }
 0x1be   :  { %v3589_v49 = vunpack.i.h.bf16 %v3055_v48  ;;  %v3591_v50 = vunpack.i.l.bf16 %v3055_v48  ;;  %v385_v4 = vpop.f32.mrf.mxu3 }
 0x1c0   :  { %v587_v51 = vrot.slane %v3589_v49, 7  ;;  %v584_v52 = vrot.slane %v3591_v50, 7  ;;  %v544_v54 = vrot.slane %v3589_v49, 6  ;;  %v541_v57 = vrot.slane %v3591_v50, 6 }
 0x1c1   :  { %v729_v53 = vrot.slane %v3591_v50, 1  ;;  %v792_v19 = vrot.slane %v3589_v49, 2 }
 0x1c2   :  { %v591_v27 = vsel %vm311_vm3, %v587_v51, %v584_v52  ;;  %v549_v3 = vsel %vm545_vm11, %v544_v54, %v541_v57 }
 0x1c3   :  { %v592_v9 = vsel %vm320_vm7, %v591_v27, 0.0  ;;  %v574_v25 = vsel %vm554_vm12, %v549_v3, 0.0  ;;  %v543_v27 = vrot.slane %v3586_v31, 6 }
 0x1c4   :  { %v503_v45 = vpop.f32.mrf.mxu1 }
 0x1c5   :  { %v3605_v55 = vpop.permute.xlu0 %531 }
 0x1c6   :  { %v542_v62 = vrot.slane %v3605_v55, 6  ;;  %v585_v0 = vrot.slane %v3605_v55, 7  ;;  %v730_v2 = vrot.slane %v3605_v55, 1  ;;  %v387_v3 = vpop.f32.mrf.mxu3 }
 0x1c8   :  { %v734_v6 = vsel %vm436_vm4, %v730_v2, %v731_v59  ;;  %v735_v8 = vsel %vm436_vm4, %v729_v53, %v730_v2  ;;  %v590_v13 = vsel %vm311_vm3, %v584_v52, %v585_v0  ;;  %v548_v18 = vsel %vm545_vm11, %v541_v57, %v542_v62 }
 0x1c9   :  { %v738_v12 = vsel %vm450_vm5, %v734_v6, 0.0  ;;  %v601_v47 = vpack.c.bf16 %v590_v13, %v592_v9  ;;  %v582_v48 = vpack.c.bf16 %v548_v18, %v574_v25  ;;  %v552_v52 = vadd.s32 4294967294, %v168_v29 }
 0x1ca   :  { %v746_v46 = vpack.c.bf16 %v738_v12, %v735_v8  ;;  %v732_v57 = vrot.slane %v3589_v49, 1  ;;  %v586_v2 = vrot.slane %v3586_v31, 7  ;;  %v547_v9 = vsel %vm545_vm11, %v542_v62, %v543_v27 }
 0x1cb   :  { %2410 = vmatmul.msk.bf16.vlgmr.msrb.gmra.mxu2 %vm369_vm10, %v601_v47  ;;  %2420 = vmatmul.msk.bf16.vlgmr.msrb.gmra.mxu3 %vm369_vm10, %v582_v48  ;;  %vm556_vm13 = vcmp.ge.s32.totalorder %v552_v52, 0  ;;  %v789_v52 = vrot.slane %v3591_v50, 2 }
 0x1cc   :  { %v422_v35 = vpop.f32.mrf.mxu0  ;;  %2435 = vmatmul.msk.bf16.gmra.mxu0 %vm369_vm10, %v687_v30  ;;  %2448 = vmatmul.msk.bf16.vlgmr.msrb.gmra.mxu1 %vm369_vm10, %v746_v46  ;;  %v505_v6 = vpop.f32.mrf.mxu1  ;;  %v736_v24 = vsel %vm436_vm4, %v732_v57, %v729_v53  ;;  %v576_v18 = vsel %vm556_vm13, %v547_v9, 0.0  ;;  %v733_v25 = vsel %vm436_vm4, %v731_v59, %v732_v57  ;;  %v588_v62 = vsel %vm311_vm3, %v586_v2, %v587_v51  ;;  %v3060_v9 = vld [vmem:[%s3846_s8] ss:$0 sm:$0xff] }
 0x1cd   :  { %v423_v41 = vadd.f32 %v422_v35, %v385_v4  ;;  %v589_v4 = vsel %vm311_vm3, %v585_v0, %v586_v2  ;;  %v740_v0 = vsel %vm452_vm8, %v736_v24, 0.0  ;;  %v790_v59 = vrot.slane %v3605_v55, 2 }
 0x1ce   :  { %v594_v13 = vsel %vm322_vm9, %v589_v4, 0.0  ;;  %v747_v47 = vpack.c.bf16 %v740_v0, %v733_v25  ;;  %v791_v35 = vrot.slane %v3586_v31, 2  ;;  %v3061_v25 = vld [vmem:[%s3848_s10] ss:$0 sm:$0xff]  ;;  %vm1201_vm3 = vcmask 785408  }
 0x1cf   :  { %v3630_v32 = vadd.f32 %v503_v45, %v423_v41  ;;  %v546_v45 = vsel %vm545_vm11, %v543_v27, %v544_v54  ;;  %v602_v46 = vpack.c.bf16 %v588_v62, %v594_v13  ;;  %v390_v48 = vpop.f32.mrf.mxu3  ;;  %v799_v54 = vadd.s32 2, %v161_v26 }
 0x1d0   :  { %v583_v53 = vpack.c.bf16 %v546_v45, %v576_v18  ;;  %v795_v41 = vsel %vm793_vm14, %v790_v59, %v791_v35  ;;  %v796_v57 = vsel %vm793_vm14, %v789_v52, %v790_v59  ;;  %v797_v26 = vsel %vm793_vm14, %v792_v19, %v789_v52 }
 0x1d1   :  { %vm807_vm15 = vcmp.lt.s32.totalorder %v799_v54, 16  ;;  %v794_v61 = vsel %vm793_vm14, %v791_v35, %v792_v19  ;;  %v825_v5 = vsel %vm809_vm0, %v797_v26, 0.0  ;;  %vm2344_vm4 = vcmask 1024  }
 0x1d2   :  { %v823_v15 = vsel %vm807_vm15, %v795_v41, 0.0 }
 0x1d3   :  { %v831_v21 = vpack.c.bf16 %v823_v15, %v796_v57 }
 0x1d4   :  { %v424_v8 = vpop.f32.mrf.mxu0  ;;  %v508_v36 = vpop.f32.mrf.mxu1 }
 0x1d5   :  { %v425_v12 = vadd.f32 %v424_v8, %v387_v3 }
 0x1d7   :  { %v3643_v29 = vadd.f32 %v505_v6, %v425_v12 }
 0x1db   :  { %2411 = vmatmul.msk.bf16.gmra.mxu2 %vm369_vm10, %v602_v46  ;;  %2421 = vmatmul.msk.bf16.gmra.mxu3 %vm369_vm10, %v583_v53 }
 0x1dc   :  { %v427_v37 = vpop.f32.mrf.mxu0  ;;  %2449 = vmatmul.msk.bf16.gmra.mxu1 %vm369_vm10, %v747_v47  ;;  %2474 = vmatmul.msk.bf16.vlgmr.msrb.gmra.mxu0 %vm262_vm6, %v928_v33  ;;  %v3697_v23 = vpop.f32.mrf.mxu1 }
 0x1dd   :  { %v428_v30 = vadd.f32 %v427_v37, %v390_v48  ;;  %v3701_v33 = vpop.f32.mrf.mxu3 }
 0x1df   :  { %v3662_v51 = vadd.f32 %v508_v36, %v428_v30 }
 0x1e4   :  { %v3695_v17 = vpop.f32.mrf.mxu0 }
 0x1eb   :  { %2462 = vmatmul.msk.bf16.vlgmr.msra.gmra.mxu2 %vm369_vm10, %v831_v21  ;;  %2468 = vmatmul.msk.bf16.vlgmr.msra.gmra.mxu3 %vm262_vm6, %v933_v10  ;;  %v832_v10 = vpack.c.bf16 %v825_v5, %v794_v61 }
 0x1ec   :  { %2475 = vmatmul.msk.bf16.gmra.mxu0 %vm262_vm6, %v929_v40  ;;  %2480 = vmatmul.msk.bf16.vlgmr.msra.gmra.mxu1 %vm262_vm6, %v1012_v42 }
 0x1fb   :  { %2463 = vmatmul.msk.bf16.gmra.mxu2 %vm369_vm10, %v832_v10  ;;  %2469 = vmatmul.msk.bf16.gmra.mxu3 %vm262_vm6, %v934_v14 }
 0x1fc   :  { %2481 = vmatmul.msk.bf16.gmra.mxu1 %vm262_vm6, %v1013_v44 }
 0x239   :  { %v715_v28 = vpop.f32.mrf.mxu0 }
 0x241   :  { %v717_v38 = vpop.f32.mrf.mxu0 }
 0x249   :  { %v775_v34 = vpop.f32.mrf.mxu1  ;;  %v720_v14 = vpop.f32.mrf.mxu0 }
 0x24e   :  { %v630_v40 = vpop.f32.mrf.mxu2  ;;  %v667_v1 = vpop.f32.mrf.mxu3 }
 0x24f   :  { %v668_v55 = vadd.f32 %v667_v1, %v630_v40 }
 0x251   :  { %v777_v7 = vpop.f32.mrf.mxu1  ;;  %v722_v49 = vpop.f32.mrf.mxu0  ;;  %v725_v3 = vadd.f32 %v715_v28, %v668_v55  ;;  %v2940_v55 = vld [vmem:[#allocation10 + $0x28] sm:$0xff] }
 0x252   :  { %1262 = vmatpush.bf16.msrb.mxu3 %v2940_v55 }
 0x253   :  { %v785_v4 = vadd.f32 %v775_v34, %v725_v3  ;;  %v2970_v3 = vld [vmem:[#allocation10 + $0x118] sm:$0xff] }
 0x254   :  { %1541 = vmatpush.bf16.msrb.mxu1 %v2970_v3 }
 0x256   :  { %v632_v42 = vpop.f32.mrf.mxu2  ;;  %v669_v31 = vpop.f32.mrf.mxu3 }
 0x257   :  { %v670_v36 = vadd.f32 %v669_v31, %v632_v42 }
 0x259   :  { %v780_v39 = vpop.f32.mrf.mxu1  ;;  %v987_v6 = vpop.f32.mrf.mxu0  ;;  %v726_v19 = vadd.f32 %v717_v38, %v670_v36  ;;  %v2956_v36 = vld [vmem:[#allocation10 + $0xa8] sm:$0xff] }
 0x25e   :  { %v635_v43 = vpop.f32.mrf.mxu2  ;;  %v672_v44 = vpop.f32.mrf.mxu3 }
 0x25f   :  { %v673_v53 = vadd.f32 %v672_v44, %v635_v43  ;;  %v305_v44 = vadd.f32 %v3699_v22, %v3498_v58  ;;  %v2939_v58 = vld [vmem:[#allocation10 + $0x20] sm:$0xff]  ;;  %v2944_v22 = vld [vmem:[#allocation10 + $0x48] sm:$0xff] }
 0x260   :  { %1263 = vmatpush.bf16.msrb.mxu3 %v2939_v58 }
 0x261   :  { %v782_v50 = vpop.f32.mrf.mxu1  ;;  %v989_v45 = vpop.f32.mrf.mxu0  ;;  %v727_v30 = vadd.f32 %v720_v14, %v673_v53  ;;  %v2961_v53 = vld [vmem:[#allocation10 + $0xd0] sm:$0xff] }
 0x263   :  { %v787_v35 = vadd.f32 %v780_v39, %v727_v30  ;;  %v2960_v30 = vld [vmem:[#allocation10 + $0xc8] sm:$0xff] }
 0x266   :  { %v637_v27 = vpop.f32.mrf.mxu2  ;;  %v674_v2 = vpop.f32.mrf.mxu3 }
 0x267   :  { %v675_v54 = vadd.f32 %v674_v2, %v637_v27  ;;  %v2945_v27 = vld [vmem:[#allocation10 + $0x50] sm:$0xff]  ;;  %v2938_v2 = vld [vmem:[#allocation10 + $0x18] sm:$0xff] }
 0x268   :  { %1264 = vmatpush.bf16.msrb.mxu3 %v2938_v2 }
 0x269   :  { %v1035_v8 = vpop.f32.mrf.mxu1  ;;  %v992_v59 = vpop.f32.mrf.mxu0  ;;  %v728_v20 = vadd.f32 %v722_v49, %v675_v54  ;;  %v2965_v54 = vld [vmem:[#allocation10 + $0xf0] sm:$0xff] }
 0x26b   :  { %v788_v10 = vadd.f32 %v782_v50, %v728_v20  ;;  %v2987_v20 = vld [vmem:[#allocation10 + $0x1a0] sm:$0xff] }
 0x26e   :  { %v860_v12 = vpop.f32.mrf.mxu2  ;;  %v956_v24 = vpop.f32.mrf.mxu3 }
 0x26f   :  { %v870_v13 = vadd.f32 %v860_v12, %v785_v4  ;;  %v988_v18 = vadd.f32 %v987_v6, %v956_v24  ;;  %v2943_v6 = vld [vmem:[#allocation10 + $0x40] sm:$0xff]  ;;  %v2942_v4 = vld [vmem:[#allocation10 + $0x38] sm:$0xff]  ;;  %v2936_v12 = vld [vmem:[#allocation10 + $0x8] sm:$0xff] }
 0x270   :  { %v2968_v24 = vld [vmem:[#allocation10 + $0x108] sm:$0xff] }
 0x271   :  { %v878_v0 = vadd.f32 %v3060_v9, %v870_v13  ;;  %v1045_v62 = vadd.f32 %v1035_v8, %v988_v18  ;;  %v1037_v47 = vpop.f32.mrf.mxu1  ;;  %v994_v38 = vpop.f32.mrf.mxu0  ;;  %v2964_v8 = vld [vmem:[#allocation10 + $0xe8] sm:$0xff]  ;;  %v2941_v13 = vld [vmem:[#allocation10 + $0x30] sm:$0xff] }
 0x272   :  { %1471 = vmatpush.bf16.msra.mxu0 %v2964_v8  ;;  %v2952_v18 = vld [vmem:[#allocation10 + $0x88] sm:$0xff] }
 0x273   :  { %1061 = vrot.lane.b32.xlu2 %v878_v0, %s3228_s4  ;;  %v1053_v46 = vadd.f32 %v3061_v25, %v1045_v62  ;;  %v2935_v0 = vld [vmem:[#allocation10] sm:$0xff]  ;;  %v2958_v62 = vld [vmem:[#allocation10 + $0xb8] sm:$0xff] }
 0x275   :  { %1077 = vrot.lane.b32.xlu0 %v1053_v46, %s3220_s3  ;;  %v2951_v46 = vld [vmem:[#allocation10 + $0x80] sm:$0xff] }
 0x276   :  { %v862_v48 = vpop.f32.mrf.mxu2  ;;  %v958_v37 = vpop.f32.mrf.mxu3 }
 0x277   :  { %v990_v14 = vadd.f32 %v989_v45, %v958_v37  ;;  %v2967_v45 = vld [vmem:[#allocation10 + $0x100] sm:$0xff]  ;;  %v2950_v37 = vld [vmem:[#allocation10 + $0x78] sm:$0xff] }
 0x279   :  { %v1040_v21 = vpop.f32.mrf.mxu1 }
 0x27b   :  { %1110 = vrot.lane.b32.xlu2 %v3504_v63, %s3220_s3  ;;  %v786_v63 = vadd.f32 %v777_v7, %v726_v19  ;;  %v2948_v19 = vld [vmem:[#allocation10 + $0x68] sm:$0xff] }
 0x27d   :  { %v871_v34 = vadd.f32 %v862_v48, %v786_v63  ;;  %v2966_v48 = vld [vmem:[#allocation10 + $0xf8] sm:$0xff] }
 0x27e   :  { %v865_v41 = vpop.f32.mrf.mxu2  ;;  %v961_v52 = vpop.f32.mrf.mxu3 }
 0x27f   :  { %v872_v57 = vadd.f32 %v865_v41, %v787_v35  ;;  %v993_v15 = vadd.f32 %v992_v59, %v961_v52  ;;  %v879_v31 = vadd.f32 %v3060_v9, %v871_v34  ;;  %v2994_v59 = vld [vmem:[#allocation10 + $0x1d8] sm:$0xff]  ;;  %v1105_v35 = vpop.permute.xlu2 %1104  ;;  %v2949_v41 = vld [vmem:[#allocation10 + $0x70] sm:$0xff]  ;;  %v2959_v52 = vld [vmem:[#allocation10 + $0xc0] sm:$0xff] }
 0x280   :  { %v2991_v34 = vld [vmem:[#allocation10 + $0x1c0] sm:$0xff] }
 0x281   :  { %v880_v26 = vadd.f32 %v3060_v9, %v872_v57  ;;  %v1047_v61 = vadd.f32 %v1040_v21, %v993_v15  ;;  %v1042_v7 = vpop.f32.mrf.mxu1  ;;  %v2988_v57 = vld [vmem:[#allocation10 + $0x1a8] sm:$0xff]  ;;  %v2955_v15 = vld [vmem:[#allocation10 + $0xa0] sm:$0xff]  ;;  %v2993_v21 = vld [vmem:[#allocation10 + $0x1d0] sm:$0xff] }
 0x283   :  { %1106 = vrot.lane.b32.xlu2 %v3495_v56, %s3220_s3  ;;  %1065 = vrot.lane.b32.xlu0 %v880_v26, %s3228_s4  ;;  %v1055_v5 = vadd.f32 %v3061_v25, %v1047_v61  ;;  %v1046_v56 = vadd.f32 %v1037_v47, %v990_v14  ;;  %v2957_v47 = vld [vmem:[#allocation10 + $0xb0] sm:$0xff]  ;;  %v2954_v26 = vld [vmem:[#allocation10 + $0x98] sm:$0xff]  ;;  %v2992_v61 = vld [vmem:[#allocation10 + $0x1c8] sm:$0xff] }
 0x285   :  { %1081 = vrot.lane.b32.xlu1 %v1055_v5, %s3220_s3  ;;  %v1054_v49 = vadd.f32 %v3061_v25, %v1046_v56  ;;  %v2947_v5 = vld [vmem:[#allocation10 + $0x60] sm:$0xff] }
 0x286   :  { %v867_v28 = vpop.f32.mrf.mxu2  ;;  %v963_v1 = vpop.f32.mrf.mxu3 }
 0x287   :  { %v873_v40 = vadd.f32 %v867_v28, %v788_v10  ;;  %v995_v39 = vadd.f32 %v994_v38, %v963_v1  ;;  %v2986_v10 = vld [vmem:[#allocation10 + $0x198] sm:$0xff]  ;;  %v2953_v28 = vld [vmem:[#allocation10 + $0x90] sm:$0xff]  ;;  %v3733_v1 = vld [vmem:[%s3844_s6] ss:$0 sm:$0xff]  ;;  %v1103_v38 = vpop.permute.xlu1 %1102 }
 0x288   :  { %v523_v58 = vadd.f32 %v3733_v1, %v3662_v51 }
 0x289   :  { %v881_v42 = vadd.f32 %v3060_v9, %v873_v40  ;;  %v1048_v43 = vadd.f32 %v1042_v7, %v995_v39  ;;  %v2963_v9 = vld [vmem:[#allocation10 + $0xe0] sm:$0xff]  ;;  %v2985_v40 = vld [vmem:[#allocation10 + $0x190] sm:$0xff]  ;;  %v521_v39 = vadd.f32 %v3733_v1, %v3630_v32 }
 0x28a   :  { %1472 = vmatpush.bf16.msra.mxu0 %v2963_v9  ;;  %v2989_v7 = vld [vmem:[#allocation10 + $0x1b0] sm:$0xff] }
 0x28b   :  { %1112 = vrot.lane.b32.xlu0 %v3517_v11, %s3220_s3  ;;  %1067 = vrot.lane.b32.xlu2 %v881_v42, %s3228_s4  ;;  %v1056_v50 = vadd.f32 %v3061_v25, %v1048_v43  ;;  %v2946_v11 = vld [vmem:[#allocation10 + $0x58] sm:$0xff] }
 0x28c   :  { %1207 = vmatpush.bf16.msrb.mxu2 %v2946_v11  ;;  %v2962_v25 = vld [vmem:[#allocation10 + $0xd8] sm:$0xff]  ;;  %v1118_v11 = vsel %vm1093_vm1, %v1103_v38, %v1105_v35  ;;  %v3017_v38 = vld [vmem:[#allocation10 + $0x290] sm:$0xff] }
 0x28d   :  { %1063 = vrot.lane.b32.xlu1 %v879_v31, %s3228_s4  ;;  %v2990_v42 = vld [vmem:[#allocation10 + $0x1b8] sm:$0xff]  ;;  %v2984_v31 = vld [vmem:[#allocation10 + $0x188] sm:$0xff] }
 0x28e   :  { %1473 = vmatpush.bf16.msra.mxu0 %v2962_v25 }
 0x290   :  { %1208 = vmatpush.bf16.msrb.mxu2 %v2945_v27 }
 0x292   :  { %1474 = vmatpush.bf16.msra.mxu0 %v2961_v53 }
 0x293   :  { %1079 = vrot.lane.b32.xlu0 %v1054_v49, %s3220_s3  ;;  %1116 = vrot.lane.b32.xlu2 %v305_v44, %s3220_s3  ;;  %v2983_v49 = vld [vmem:[#allocation10 + $0x180] sm:$0xff] }
 0x294   :  { %1209 = vmatpush.bf16.msrb.mxu2 %v2944_v22 }
 0x295   :  { %1083 = vrot.lane.b32.xlu1 %v1056_v50, %s3220_s3 }
 0x296   :  { %1475 = vmatpush.bf16.msra.mxu0 %v2960_v30 }
 0x298   :  { %1210 = vmatpush.bf16.msrb.mxu2 %v2943_v6 }
 0x29a   :  { %1476 = vmatpush.bf16.msra.mxu0 %v2959_v52  ;;  %v2982_v52 = vld [vmem:[#allocation10 + $0x178] sm:$0xff] }
 0x29b   :  { %1108 = vrot.lane.b32.xlu0 %v3502_v60, %s3220_s3  ;;  %v2937_v60 = vld [vmem:[#allocation10 + $0x10] sm:$0xff] }
 0x29c   :  { %1265 = vmatpush.bf16.msrb.mxu3 %v2937_v60  ;;  %1211 = vmatpush.bf16.msrb.mxu2 %v2942_v4  ;;  %v430_v60 = vadd.f32 %v3695_v17, %v3701_v33 }
 0x29d   :  { %1114 = vrot.lane.b32.xlu1 %v3519_v16, %s3220_s3  ;;  %v2969_v16 = vld [vmem:[#allocation10 + $0x110] sm:$0xff] }
 0x29e   :  { %1542 = vmatpush.bf16.msrb.mxu1 %v2969_v16  ;;  %1756 = vmatpush.bf16.msrb.mxu0 %v2988_v57  ;;  %v516_v51 = vadd.f32 %v3697_v23, %v430_v60 }
 0x2a0   :  { %1266 = vmatpush.bf16.msrb.mxu3 %v2936_v12  ;;  %1212 = vmatpush.bf16.msrb.mxu2 %v2941_v13 }
 0x2a2   :  { %1543 = vmatpush.bf16.msrb.mxu1 %v2968_v24  ;;  %1757 = vmatpush.bf16.msrb.mxu0 %v2987_v20  ;;  %v3018_v20 = vld [vmem:[#allocation10 + $0x298] sm:$0xff] }
 0x2a4   :  { %1331 = vmatpush.bf16.msra.mxu2 %v2952_v18  ;;  %1267 = vmatpush.bf16.msrb.mxu3 %v2935_v0 }
 0x2a6   :  { %1544 = vmatpush.bf16.msrb.mxu1 %v2967_v45  ;;  %1758 = vmatpush.bf16.msrb.mxu0 %v2986_v10 }
 0x2a8   :  { %1401 = vmatpush.bf16.msra.mxu3 %v2958_v62  ;;  %1332 = vmatpush.bf16.msra.mxu2 %v2951_v46 }
 0x2aa   :  { %1545 = vmatpush.bf16.msrb.mxu1 %v2966_v48  ;;  %1759 = vmatpush.bf16.msrb.mxu0 %v2985_v40  ;;  %v522_v40 = vadd.f32 %v3733_v1, %v3643_v29 }
 0x2ac   :  { %1402 = vmatpush.bf16.msra.mxu3 %v2957_v47  ;;  %1333 = vmatpush.bf16.msra.mxu2 %v2950_v37  ;;  %v2976_v47 = vld [vmem:[#allocation10 + $0x148] sm:$0xff] }
 0x2ae   :  { %1546 = vmatpush.bf16.msrb.mxu1 %v2965_v54  ;;  %1760 = vmatpush.bf16.msrb.mxu0 %v2984_v31  ;;  %v3011_v31 = vld [vmem:[#allocation10 + $0x260] sm:$0xff] }
 0x2b0   :  { %1403 = vmatpush.bf16.msra.mxu3 %v2956_v36  ;;  %1334 = vmatpush.bf16.msra.mxu2 %v2949_v41 }
 0x2b2   :  { %1825 = vmatpush.bf16.msra.mxu1 %v2994_v59  ;;  %1761 = vmatpush.bf16.msrb.mxu0 %v2983_v49 }
 0x2b4   :  { %1404 = vmatpush.bf16.msra.mxu3 %v2955_v15  ;;  %1335 = vmatpush.bf16.msra.mxu2 %v2948_v19 }
 0x2b6   :  { %1826 = vmatpush.bf16.msra.mxu1 %v2993_v21 }
 0x2b8   :  { %1405 = vmatpush.bf16.msra.mxu3 %v2954_v26  ;;  %1336 = vmatpush.bf16.msra.mxu2 %v2947_v5  ;;  %v3012_v26 = vld [vmem:[#allocation10 + $0x268] sm:$0xff]  ;;  %v2975_v5 = vld [vmem:[#allocation10 + $0x140] sm:$0xff] }
 0x2ba   :  { %1827 = vmatpush.bf16.msra.mxu1 %v2992_v61 }
 0x2bc   :  { %1406 = vmatpush.bf16.msra.mxu3 %v2953_v28 }
 0x2be   :  { %1828 = vmatpush.bf16.msra.mxu1 %v2991_v34 }
 0x2c2   :  { %1829 = vmatpush.bf16.msra.mxu1 %v2990_v42 }
 0x2c6   :  { %1830 = vmatpush.bf16.msra.mxu1 %v2989_v7 }
 0x2cd   :  { %v1062_v63 = vpop.permute.xlu2 %1061 }
 0x2ce   :  { %v1089_v43 = vsel %vm369_vm10, %v521_v39, %v1062_v63  ;;  %v524_v39 = vadd.f32 %v3733_v1, %v516_v51 }
 0x2d5   :  { %v1111_v56 = vpop.permute.xlu2 %1110 }
 0x2dd   :  { %v3742_v32 = vpop.permute.xlu2 %1106 }
 0x2e5   :  { %v1068_v45 = vpop.permute.xlu2 %1067 }
 0x2e6   :  { %v1092_v49 = vsel %vm369_vm10, %v524_v39, %v1068_v45 }
 0x2e7   :  { %v1078_v14 = vpop.permute.xlu0 %1077 }
 0x2e8   :  { %v1094_v44 = vsel %vm1093_vm1, %v1089_v43, %v1078_v14  ;;  %v2981_v14 = vld [vmem:[#allocation10 + $0x170] sm:$0xff]  ;;  %v2974_v43 = vld [vmem:[#allocation10 + $0x138] sm:$0xff] }
 0x2e9   :  { %v1126_v55 = vadd.f32 %v1118_v11, %v1094_v44 }
 0x2eb   :  { %v1142_v22 = vpack.c.bf16 %v1126_v55, %v1126_v55 }
 0x2ed   :  { %v1159_v16 = vunpack.c.l.b16 %v1142_v22  ;;  %v3016_v22 = vld [vmem:[#allocation10 + $0x288] sm:$0xff] }
 0x2ef   :  { %v1161_v13 = vrot.slane %v1159_v16, 1  ;;  %v1426_v18 = vrot.slane %v1159_v16, 4  ;;  %v1496_v25 = vrot.slane %v1159_v16, 5  ;;  %v1286_v0 = vrot.slane %v1159_v16, 2 }
 0x2f0   :  { %v1356_v62 = vrot.slane %v1159_v16, 3  ;;  %v1566_v54 = vrot.slane %v1159_v16, 6  ;;  %v1636_v61 = vrot.slane %v1159_v16, 7 }
 0x2f5   :  { %v1066_v50 = vpop.permute.xlu0 %1065 }
 0x2f6   :  { %v1091_v2 = vsel %vm369_vm10, %v523_v58, %v1066_v50  ;;  %v1117_v50 = vpop.permute.xlu2 %1116 }
 0x2f7   :  { %v1082_v27 = vpop.permute.xlu1 %1081 }
 0x2f8   :  { %v1096_v6 = vsel %vm1093_vm1, %v1091_v2, %v1082_v27  ;;  %v2980_v27 = vld [vmem:[#allocation10 + $0x168] sm:$0xff]  ;;  %v3010_v2 = vld [vmem:[#allocation10 + $0x258] sm:$0xff] }
 0x2fd   :  { %v1113_v3 = vpop.permute.xlu0 %1112 }
 0x2fe   :  { %v1120_v8 = vsel %vm1093_vm1, %v1111_v56, %v1113_v3 }
 0x2ff   :  { %v1128_v4 = vadd.f32 %v1120_v8, %v1096_v6  ;;  %v1064_v9 = vpop.permute.xlu1 %1063  ;;  %v2973_v8 = vld [vmem:[#allocation10 + $0x130] sm:$0xff] }
 0x300   :  { %v1090_v56 = vsel %vm369_vm10, %v522_v40, %v1064_v9 }
 0x301   :  { %v1143_v12 = vpack.c.bf16 %v1128_v4, %v1128_v4  ;;  %v3015_v4 = vld [vmem:[#allocation10 + $0x280] sm:$0xff] }
 0x303   :  { %v1160_v24 = vunpack.c.l.b16 %v1143_v12  ;;  %v2972_v12 = vld [vmem:[#allocation10 + $0x128] sm:$0xff] }
 0x305   :  { %v1080_v46 = vpop.permute.xlu0 %1079  ;;  %v1163_v53 = vsel %vm1162_vm2, %v1160_v24, %v1161_v13  ;;  %v1218_v17 = vrot.slane %v1160_v24, 7  ;;  %v1427_v33 = vrot.slane %v1160_v24, 3  ;;  %v1497_v48 = vrot.slane %v1160_v24, 4 }
 0x306   :  { %v1164_v37 = vpack.c.b16 %v1163_v53, %v1163_v53  ;;  %v1287_v30 = vrot.slane %v1160_v24, 1  ;;  %v1357_v36 = vrot.slane %v1160_v24, 2  ;;  %v1567_v57 = vrot.slane %v1160_v24, 5 }
 0x307   :  { %v1084_v23 = vpop.permute.xlu1 %1083  ;;  %v1219_v59 = vsel %vm1162_vm2, %v1218_v17, %v1159_v16  ;;  %v1428_v35 = vsel %vm1162_vm2, %v1427_v33, %v1426_v18  ;;  %v1498_v41 = vsel %vm1162_vm2, %v1497_v48, %v1496_v25  ;;  %v1637_v34 = vrot.slane %v1160_v24, 6  ;;  %v2979_v16 = vld [vmem:[#allocation10 + $0x160] sm:$0xff]  ;;  %v3009_v24 = vld [vmem:[#allocation10 + $0x250] sm:$0xff]  ;;  %v2978_v18 = vld [vmem:[#allocation10 + $0x158] sm:$0xff] }
 0x308   :  { %2506 = vmatmul.msk.bf16.vlgmr.msrb.gmra.mxu2 %vm1201_vm3, %v1164_v37  ;;  %v1220_v15 = vpack.c.b16 %v1219_v59, %v1219_v59  ;;  %v1429_v21 = vpack.c.b16 %v1428_v35, %v1428_v35  ;;  %v1499_v19 = vpack.c.b16 %v1498_v41, %v1498_v41  ;;  %v1288_v63 = vsel %vm1162_vm2, %v1287_v30, %v1286_v0  ;;  %v3008_v33 = vld [vmem:[#allocation10 + $0x248] sm:$0xff]  ;;  %v3006_v35 = vld [vmem:[#allocation10 + $0x238] sm:$0xff]  ;;  %v3013_v41 = vld [vmem:[#allocation10 + $0x270] sm:$0xff] }
 0x309   :  { %1611 = vmatpush.bf16.msrb.mxu2 %v2976_v47  ;;  %v3757_v10 = vsel %vm1162_vm2, %v1357_v36, %v1356_v62  ;;  %v3760_v28 = vsel %vm1162_vm2, %v1567_v57, %v1566_v54  ;;  %v3768_v42 = vsel %vm1162_vm2, %v1637_v34, %v1636_v61  ;;  %v1095_v29 = vsel %vm1093_vm1, %v1090_v56, %v1080_v46  ;;  %v3014_v46 = vld [vmem:[#allocation10 + $0x278] sm:$0xff]  ;;  %v2971_v47 = vld [vmem:[#allocation10 + $0x120] sm:$0xff]  ;;  %v3000_v36 = vld [vmem:[#allocation10 + $0x208] sm:$0xff] }
 0x30a   :  { %2531 = vmatmul.msk.bf16.vlgmr.msrb.gmra.mxu3 %vm1201_vm3, %v1220_v15  ;;  %2606 = vmatmul.msk.bf16.vlgmr.msra.gmra.mxu0 %vm1201_vm3, %v1429_v21  ;;  %v1097_v58 = vsel %vm1093_vm1, %v1092_v49, %v1084_v23  ;;  %v1289_v13 = vpack.c.b16 %v1288_v63, %v1288_v63  ;;  %v1359_v62 = vpack.c.b16 %v3757_v10, %v3757_v10  ;;  %v2977_v23 = vld [vmem:[#allocation10 + $0x150] sm:$0xff]  ;;  %v3007_v57 = vld [vmem:[#allocation10 + $0x240] sm:$0xff]  ;;  %v3004_v61 = vld [vmem:[#allocation10 + $0x228] sm:$0xff] }
 0x30b   :  { %2631 = vmatmul.msk.bf16.vlgmr.msrb.gmra.mxu1 %vm1201_vm3, %v1499_v19  ;;  %1681 = vmatpush.bf16.msrb.mxu3 %v2982_v52  ;;  %v2999_v15 = vld [vmem:[#allocation10 + $0x200] sm:$0xff]  ;;  %v3005_v21 = vld [vmem:[#allocation10 + $0x230] sm:$0xff]  ;;  %v2998_v19 = vld [vmem:[#allocation10 + $0x1f8] sm:$0xff]  ;;  %v1569_v10 = vpack.c.b16 %v3760_v28, %v3760_v28 }
 0x30c   :  { %2105 = vmatpush.bf16.msrb.mxu1 %v3018_v20  ;;  %2035 = vmatpush.bf16.msra.mxu0 %v3012_v26  ;;  %v2997_v34 = vld [vmem:[#allocation10 + $0x1f0] sm:$0xff]  ;;  %v3002_v28 = vld [vmem:[#allocation10 + $0x218] sm:$0xff] }
 0x30d   :  { %1612 = vmatpush.bf16.msrb.mxu2 %v2975_v5  ;;  %v1109_v7 = vpop.permute.xlu0 %1108  ;;  %v3030_v49 = vld [vmem:[#allocation10 + $0x2f8] sm:$0xff] }
 0x30e   :  { %v1119_v44 = vsel %vm1093_vm1, %v3742_v32, %v1109_v7  ;;  %v2996_v7 = vld [vmem:[#allocation10 + $0x1e8] sm:$0xff] }
 0x30f   :  { %v1127_v11 = vadd.f32 %v1119_v44, %v1095_v29  ;;  %1682 = vmatpush.bf16.msrb.mxu3 %v2981_v14  ;;  %v1115_v55 = vpop.permute.xlu1 %1114  ;;  %v3024_v29 = vld [vmem:[#allocation10 + $0x2c8] sm:$0xff] }
 0x310   :  { %v1121_v1 = vsel %vm1093_vm1, %v1115_v55, %v1117_v50  ;;  %2106 = vmatpush.bf16.msrb.mxu1 %v3017_v38  ;;  %2036 = vmatpush.bf16.msra.mxu0 %v3011_v31  ;;  %v1639_v38 = vpack.c.b16 %v3768_v42, %v3768_v42  ;;  %v3003_v31 = vld [vmem:[#allocation10 + $0x220] sm:$0xff]  ;;  %v3001_v42 = vld [vmem:[#allocation10 + $0x210] sm:$0xff] }
 0x311   :  { %v1706_v3 = vpack.c.bf16 %v1127_v11, %v1127_v11  ;;  %v1129_v6 = vadd.f32 %v1121_v1, %v1097_v58  ;;  %1613 = vmatpush.bf16.msrb.mxu2 %v2974_v43  ;;  %v2995_v43 = vld [vmem:[#allocation10 + $0x1e0] sm:$0xff]  ;;  %v3029_v1 = vld [vmem:[#allocation10 + $0x2f0] sm:$0xff] }
 0x312   :  { %v3023_v55 = vld [vmem:[#allocation10 + $0x2c0] sm:$0xff] }
 0x313   :  { %v3778_v32 = vunpack.c.l.b16 %v1706_v3  ;;  %v1707_v60 = vpack.c.bf16 %v1129_v6, %v1129_v6  ;;  %1683 = vmatpush.bf16.msrb.mxu3 %v2980_v27  ;;  %v3022_v3 = vld [vmem:[#allocation10 + $0x2b8] sm:$0xff] }
 0x314   :  { %2107 = vmatpush.bf16.msrb.mxu1 %v3016_v22  ;;  %2037 = vmatpush.bf16.msra.mxu0 %v3010_v2 }
 0x315   :  { %v3780_v9 = vunpack.c.l.b16 %v1707_v60  ;;  %1614 = vmatpush.bf16.msrb.mxu2 %v2973_v8  ;;  %v1781_v51 = vrot.slane %v3778_v32, 1  ;;  %v2130_v48 = vrot.slane %v3778_v32, 6  ;;  %v2200_v54 = vrot.slane %v3778_v32, 7  ;;  %v3028_v8 = vld [vmem:[#allocation10 + $0x2e8] sm:$0xff]  ;;  %v3021_v60 = vld [vmem:[#allocation10 + $0x2b0] sm:$0xff] }
 0x316   :  { %v2060_v5 = vrot.slane %v3778_v32, 5  ;;  %v1990_v63 = vrot.slane %v3778_v32, 4  ;;  %v1850_v50 = vrot.slane %v3778_v32, 2  ;;  %v1920_v58 = vrot.slane %v3778_v32, 3 }
 0x317   :  { %1684 = vmatpush.bf16.msrb.mxu3 %v2979_v16  ;;  %v1782_v25 = vsel %vm1162_vm2, %v3780_v9, %v1781_v51  ;;  %v1712_v0 = vrot.slane %v3780_v9, 7  ;;  %v2131_v53 = vrot.slane %v3780_v9, 5  ;;  %v2201_v37 = vrot.slane %v3780_v9, 6  ;;  %v3027_v16 = vld [vmem:[#allocation10 + $0x2e0] sm:$0xff] }
 0x318   :  { %2556 = vmatmul.msk.bf16.vlgmr.msra.gmra.mxu2 %vm1201_vm3, %v1289_v13  ;;  %v1783_v45 = vpack.c.b16 %v1782_v25, %v1782_v25  ;;  %2108 = vmatpush.bf16.msrb.mxu1 %v3015_v4  ;;  %v2061_v20 = vrot.slane %v3780_v9, 4  ;;  %v1991_v26 = vrot.slane %v3780_v9, 3  ;;  %v1851_v44 = vrot.slane %v3780_v9, 1  ;;  %v3026_v4 = vld [vmem:[#allocation10 + $0x2d8] sm:$0xff] }
 0x319   :  { %1615 = vmatpush.bf16.msrb.mxu2 %v2972_v12  ;;  %v1713_v17 = vsel %vm1162_vm2, %v1712_v0, %v3778_v32  ;;  %2038 = vmatpush.bf16.msra.mxu0 %v3009_v24  ;;  %v3798_v59 = vsel %vm1162_vm2, %v2131_v53, %v2130_v48  ;;  %v3802_v52 = vsel %vm1162_vm2, %v2201_v37, %v2200_v54  ;;  %v1921_v11 = vrot.slane %v3780_v9, 2  ;;  %v3020_v32 = vld [vmem:[#allocation10 + $0x2a8] sm:$0xff]  ;;  %v3019_v9 = vld [vmem:[#allocation10 + $0x2a0] sm:$0xff]  ;;  %v3025_v12 = vld [vmem:[#allocation10 + $0x2d0] sm:$0xff] }
 0x31a   :  { %2581 = vmatmul.msk.bf16.vlgmr.msra.gmra.mxu3 %vm1201_vm3, %v1359_v62  ;;  %v1714_v30 = vpack.c.b16 %v1713_v17, %v1713_v17  ;;  %v2062_v40 = vsel %vm1162_vm2, %v2061_v20, %v2060_v5  ;;  %v1992_v14 = vsel %vm1162_vm2, %v1991_v26, %v1990_v63  ;;  %v1852_v27 = vsel %vm1162_vm2, %v1851_v44, %v1850_v50  ;;  %v3037_v17 = vld [vmem:[#allocation11 + $0x30] sm:$0xff]  ;;  %v3036_v54 = vld [vmem:[#allocation11 + $0x28] sm:$0xff] }
 0x31b   :  { %1685 = vmatpush.bf16.msrb.mxu3 %v2978_v18  ;;  %2731 = vmatmul.msk.bf16.vlgmr.msra.gmra.mxu1 %vm1201_vm3, %v1783_v45  ;;  %v2063_v39 = vpack.c.b16 %v2062_v40, %v2062_v40  ;;  %v1993_v56 = vpack.c.b16 %v1992_v14, %v1992_v14  ;;  %v1922_v22 = vsel %vm1162_vm2, %v1921_v11, %v1920_v58  ;;  %v3033_v26 = vld [vmem:[#allocation11 + $0x10] sm:$0xff]  ;;  %v3032_v40 = vld [vmem:[#allocation11 + $0x8] sm:$0xff] }
 0x31c   :  { %2706 = vmatmul.msk.bf16.vlgmr.msrb.gmra.mxu0 %vm1201_vm3, %v1714_v30  ;;  %2109 = vmatpush.bf16.msrb.mxu1 %v3014_v46  ;;  %v1853_v2 = vpack.c.b16 %v1852_v27, %v1852_v27  ;;  %v1923_v6 = vpack.c.b16 %v1922_v22, %v1922_v22  ;;  %v2133_v51 = vpack.c.b16 %v3798_v59, %v3798_v59  ;;  %v3062_v22 = vld [vmem:[%s3850_s12] ss:$0 sm:$0xff] }
 0x31d   :  { %1616 = vmatpush.bf16.msrb.mxu2 %v2971_v47  ;;  %2039 = vmatpush.bf16.msra.mxu0 %v3008_v33  ;;  %v2203_v24 = vpack.c.b16 %v3802_v52, %v3802_v52  ;;  %v3038_v47 = vld [vmem:[#allocation11 + $0x38] sm:$0xff] }
 0x31f   :  { %1686 = vmatpush.bf16.msrb.mxu3 %v2977_v23 }
 0x320   :  { %2110 = vmatpush.bf16.msrb.mxu1 %v3013_v41 }
 0x321   :  { %1895 = vmatpush.bf16.msra.mxu2 %v3000_v36  ;;  %2040 = vmatpush.bf16.msra.mxu0 %v3007_v57 }
 0x323   :  { %1965 = vmatpush.bf16.msra.mxu3 %v3006_v35  ;;  %v3035_v35 = vld [vmem:[#allocation11 + $0x20] sm:$0xff] }
 0x325   :  { %1896 = vmatpush.bf16.msra.mxu2 %v2999_v15  ;;  %2331 = vmatpush.bf16.msrb.mxu0 %v3038_v47  ;;  %v3034_v15 = vld [vmem:[#allocation11 + $0x18] sm:$0xff] }
 0x327   :  { %1966 = vmatpush.bf16.msra.mxu3 %v3005_v21 }
 0x328   :  { %2656 = vmatmul.msk.bf16.vlgmr.msrb.gmra.mxu2 %vm1201_vm3, %v1569_v10 }
 0x329   :  { %1897 = vmatpush.bf16.msra.mxu2 %v2998_v19  ;;  %2332 = vmatpush.bf16.msrb.mxu0 %v3037_v17 }
 0x32a   :  { %2681 = vmatmul.msk.bf16.vlgmr.msrb.gmra.mxu3 %vm1201_vm3, %v1639_v38 }
 0x32b   :  { %1967 = vmatpush.bf16.msra.mxu3 %v3004_v61  ;;  %2831 = vmatmul.msk.bf16.vlgmr.msrb.gmra.mxu1 %vm1201_vm3, %v2063_v39  ;;  %v3031_v39 = vld [vmem:[#allocation11] sm:$0xff] }
 0x32c   :  { %2806 = vmatmul.msk.bf16.vlgmr.msra.gmra.mxu0 %vm1201_vm3, %v1993_v56 }
 0x32d   :  { %1898 = vmatpush.bf16.msra.mxu2 %v2997_v34  ;;  %2333 = vmatpush.bf16.msrb.mxu0 %v3036_v54 }
 0x32f   :  { %1968 = vmatpush.bf16.msra.mxu3 %v3003_v31 }
 0x331   :  { %1899 = vmatpush.bf16.msra.mxu2 %v2996_v7  ;;  %2334 = vmatpush.bf16.msrb.mxu0 %v3035_v35 }
 0x333   :  { %1969 = vmatpush.bf16.msra.mxu3 %v3002_v28 }
 0x335   :  { %1900 = vmatpush.bf16.msra.mxu2 %v2995_v43  ;;  %2335 = vmatpush.bf16.msrb.mxu0 %v3034_v15 }
 0x337   :  { %1970 = vmatpush.bf16.msra.mxu3 %v3001_v42 }
 0x338   :  { %2756 = vmatmul.msk.bf16.vlgmr.msra.gmra.mxu2 %vm1201_vm3, %v1853_v2 }
 0x339   :  { %2175 = vmatpush.bf16.msrb.mxu2 %v3024_v29  ;;  %2336 = vmatpush.bf16.msrb.mxu0 %v3033_v26 }
 0x33a   :  { %2781 = vmatmul.msk.bf16.vlgmr.msra.gmra.mxu3 %vm1201_vm3, %v1923_v6 }
 0x33b   :  { %2245 = vmatpush.bf16.msrb.mxu3 %v3030_v49 }
 0x33d   :  { %2176 = vmatpush.bf16.msrb.mxu2 %v3023_v55  ;;  %2337 = vmatpush.bf16.msrb.mxu0 %v3032_v40 }
 0x33f   :  { %2246 = vmatpush.bf16.msrb.mxu3 %v3029_v1 }
 0x341   :  { %2177 = vmatpush.bf16.msrb.mxu2 %v3022_v3  ;;  %2338 = vmatpush.bf16.msrb.mxu0 %v3031_v39 }
 0x343   :  { %2247 = vmatpush.bf16.msrb.mxu3 %v3028_v8 }
 0x345   :  { %2178 = vmatpush.bf16.msrb.mxu2 %v3021_v60 }
 0x347   :  { %2248 = vmatpush.bf16.msrb.mxu3 %v3027_v16 }
 0x349   :  { %2179 = vmatpush.bf16.msrb.mxu2 %v3020_v32  ;;  %v3063_v32 = vld [vmem:[#allocation2] ss:$0 sm:$0xff] }
 0x34b   :  { %2249 = vmatpush.bf16.msrb.mxu3 %v3026_v4 }
 0x34d   :  { %2180 = vmatpush.bf16.msrb.mxu2 %v3019_v9 }
 0x34f   :  { %2250 = vmatpush.bf16.msrb.mxu3 %v3025_v12 }
 0x350   :  { %2856 = vmatmul.msk.bf16.vlgmr.msrb.gmra.mxu2 %vm1201_vm3, %v2133_v51 }
 0x352   :  { %2881 = vmatmul.msk.bf16.vlgmr.msrb.gmra.mxu3 %vm1201_vm3, %v2203_v24 }
 0x387   :  { %v1478_v13 = vpop.f32.mrf.mxu0 }
 0x388   :  { %v1548_v18 = vpop.f32.mrf.mxu1 }
 0x38b   :  { %v1214_v25 = vpop.f32.mrf.mxu2 }
 0x38d   :  { %v1269_v0 = vpop.f32.mrf.mxu3 }
 0x38e   :  { %v1270_v59 = vadd.f32 %v1269_v0, %v1214_v25 }
 0x38f   :  { %v1480_v62 = vpop.f32.mrf.mxu0 }
 0x390   :  { %v1550_v45 = vpop.f32.mrf.mxu1 }
 0x393   :  { %v1216_v46 = vpop.f32.mrf.mxu2 }
 0x395   :  { %v1271_v53 = vpop.f32.mrf.mxu3 }
 0x398   :  { %v1832_v33 = vpop.f32.mrf.mxu1 }
 0x399   :  { %v1763_v48 = vpop.f32.mrf.mxu0 }
 0x39b   :  { %v1338_v37 = vpop.f32.mrf.mxu2 }
 0x39c   :  { %v1342_v52 = vadd.f32 %v1338_v37, %v1270_v59 }
 0x39d   :  { %v1408_v30 = vpop.f32.mrf.mxu3 }
 0x39e   :  { %v1412_v21 = vadd.f32 %v1408_v30, %v1342_v52 }
 0x3a0   :  { %v1834_v36 = vpop.f32.mrf.mxu1  ;;  %v1482_v5 = vadd.f32 %v1478_v13, %v1412_v21 }
 0x3a1   :  { %v1765_v23 = vpop.f32.mrf.mxu0 }
 0x3a2   :  { %v1552_v10 = vadd.f32 %v1548_v18, %v1482_v5 }
 0x3a3   :  { %v1340_v41 = vpop.f32.mrf.mxu2 }
 0x3a5   :  { %v1410_v57 = vpop.f32.mrf.mxu3 }
 0x3a8   :  { %v2112_v19 = vpop.f32.mrf.mxu1 }
 0x3a9   :  { %v2042_v20 = vpop.f32.mrf.mxu0 }
 0x3ab   :  { %v1618_v61 = vpop.f32.mrf.mxu2 }
 0x3ac   :  { %v1622_v38 = vadd.f32 %v1618_v61, %v1552_v10 }
 0x3ad   :  { %v1688_v63 = vpop.f32.mrf.mxu3 }
 0x3ae   :  { %v1692_v7 = vadd.f32 %v1688_v63, %v1622_v38 }
 0x3b0   :  { %v2114_v34 = vpop.f32.mrf.mxu1  ;;  %v1767_v28 = vadd.f32 %v1763_v48, %v1692_v7 }
 0x3b1   :  { %v2044_v14 = vpop.f32.mrf.mxu0 }
 0x3b2   :  { %v1836_v44 = vadd.f32 %v1832_v33, %v1767_v28 }
 0x3b3   :  { %v1620_v31 = vpop.f32.mrf.mxu2 }
 0x3b5   :  { %v1690_v56 = vpop.f32.mrf.mxu3 }
 0x3bb   :  { %v1902_v43 = vpop.f32.mrf.mxu2 }
 0x3bc   :  { %v1906_v42 = vadd.f32 %v1902_v43, %v1836_v44 }
 0x3bd   :  { %v1972_v29 = vpop.f32.mrf.mxu3 }
 0x3be   :  { %v1976_v50 = vadd.f32 %v1972_v29, %v1906_v42 }
 0x3c0   :  { %v2046_v55 = vadd.f32 %v2042_v20, %v1976_v50 }
 0x3c2   :  { %v2116_v27 = vadd.f32 %v2112_v19, %v2046_v55 }
 0x3c3   :  { %v1904_v49 = vpop.f32.mrf.mxu2 }
 0x3c5   :  { %v1974_v11 = vpop.f32.mrf.mxu3 }
 0x3d3   :  { %v2182_v58 = vpop.f32.mrf.mxu2 }
 0x3d4   :  { %v2186_v1 = vadd.f32 %v2182_v58, %v2116_v27 }
 0x3d5   :  { %v2252_v2 = vpop.f32.mrf.mxu3 }
 0x3d6   :  { %v2256_v3 = vadd.f32 %v2252_v2, %v2186_v1 }
 0x3d8   :  { %v2261_v6 = vadd.f32 %v3062_v22, %v2256_v3 }
 0x3da   :  { %v2278_v8 = vpack.c.bf16 %v2261_v6, %v2261_v6 }
 0x3db   :  { %v2184_v60 = vpop.f32.mrf.mxu2 }
 0x3dc   :  { %2339 = vmatmul.bf16.vlgmr.msrb.gmra.mxu0 %v2278_v8 }
 0x3dd   :  { %v2254_v16 = vpop.f32.mrf.mxu3 }
 0x459   :  { %v2340_v4 = vpop.f32.mrf.mxu0 }
 0x45a   :  { %v2341_v9 = vadd.f32 %v3063_v32, %v2340_v4 }
 0x45c   :  { %2345 = vst.msk [vmem:[%s3853_s15] sm:$0x3] %vm2344_vm4, %v2341_v9 }
 0x461   :  { %v2342_v12 = vpop.f32.mrf.mxu0 }
 0x462   :  { %2350 = vsyncpa [#allocation4], 1 }
 0x463   :  { %2351 = vsyncpa [#allocation6], 1 }
 0x464   :  { %2352 = vsyncpa [#allocation9], 1 }
 0x465   :  { %2353 = vsyncpa [#allocation12], 1 }

</bundles_post_ra>
